<compile_context>
chip_gen: v5e
topology: v5e:2x2
jax: 0.10.0
libtpu: 0.0.40
codegen_flags: <defaults>
</compile_context>

<pallas_src>
import functools

import jax
import jax.numpy as jnp
from jax import lax
from jax.experimental import pallas as pl
from jax.experimental.pallas import tpu as pltpu


def _resblock_kernel(x_ref, w_ref, b_ref, out_ref, *, W):
    """Fused conv3x3 -> ReLU -> conv3x3 -> +x on a block of `nb` images.

    x_ref : (nb, C, H*W)  channel-major, spatially flattened (lanes = H*W)
    w_ref : (2, 9, C, C)  per-tap weight matrices for both convs (mm_dtype)
    b_ref : (2, C, 1)     biases, f32
    """
    nb, C, HW = x_ref.shape
    f32 = jnp.float32
    mm_dtype = w_ref.dtype
    pad = W + 1

    # ---- hoisted: shared by both convs and all images in this block ----
    xcol = lax.broadcasted_iota(jnp.int32, (C, HW), 1) % W
    keep_l = (xcol != 0).astype(mm_dtype)        # tap x-1 invalid in column 0
    keep_r = (xcol != W - 1).astype(mm_dtype)    # tap x+1 invalid in column W-1

    w_taps = [[w_ref[j, t] for t in range(9)] for j in range(2)]          # 18 x (C, C)
    b_full = [jnp.broadcast_to(b_ref[j].astype(f32), (C, HW)) for j in range(2)]

    def conv3x3(xin, j):
        """SAME 3x3 conv of one channel-major, spatially-flattened image.

        xin: (C, HW) in mm_dtype.  Returns f32 (C, HW) = conv(x) + bias_j.
        Vertical out-of-bounds taps land in the zero pads of the flat row, so
        only the horizontal wrap (left/right column) needs masking.
        Nine small accumulated matmuls instead of a big-K im2col slab: avoids
        the sublane-misaligned 9-plane concat (MXU is nearly idle at this size).
        """
        zp = jnp.zeros((C, pad), xin.dtype)
        xe = jnp.concatenate([zp, xin, zp], axis=-1)          # (C, HW + 2W + 2)
        acc = b_full[j]                                        # f32 accumulator
        for ky in range(3):                                    # static unroll: 9 taps
            for kx in range(3):
                s = (ky - 1) * W + (kx - 1)
                plane = xe[:, pad + s: pad + s + HW]           # static lane slice
                if kx == 0:
                    plane = plane * keep_l
                elif kx == 2:
                    plane = plane * keep_r
                acc = acc + jnp.dot(w_taps[j][ky * 3 + kx], plane,
                                    preferred_element_type=f32)
        return acc

    for i in range(nb):                        # static unroll over images in block
        x32 = x_ref[i].astype(f32)             # residual copy, (C, HW), f32
        h = jnp.maximum(conv3x3(x32.astype(mm_dtype), 0), 0.0)   # conv1 + ReLU
        y = conv3x3(h.astype(mm_dtype), 1) + x32                 # conv2 + residual
        out_ref[i] = y.astype(out_ref.dtype)   # lane-dense store (HW multiple of 128)


def _default_grid_blocks(N):
    """v7x has 2 TensorCores/chip -> keep 2 parallel grid blocks so both get
    work; v5e/v6e have 1 TC -> fully collapse the grid (per-step overhead)."""
    try:
        kind = jax.devices()[0].device_kind.lower()
    except Exception:  # pragma: no cover - conservative fallback
        kind = ""
    cores = 2 if "v7" in kind else 1
    g = max(1, min(N, cores))
    while N % g:
        g -= 1
    return g


def prepare_params(params, mm_dtype=jnp.bfloat16):
    """One-time parameter transform (call once at load time, not per forward).

    PyTorch OIHW conv weights -> per-tap (2, 9, C_out, C_in) in mm_dtype
    (bf16 default for MXU peak); biases packed to (2, C, 1) f32.
    """
    w1, b1, w2, b2 = params                    # w*: (C, C, 3, 3), b*: (C,)
    C = w1.shape[0]

    def taps(w):                               # (co, ci, ky, kx) -> (ky*3+kx, co, ci)
        return jnp.transpose(w, (2, 3, 0, 1)).reshape(9, C, C)

    wpk = jnp.stack([taps(w1), taps(w2)]).astype(mm_dtype)           # (2, 9, C, C)
    bpk = jnp.stack([b1, b2]).reshape(2, C, 1).astype(jnp.float32)   # (2, C, 1)
    return wpk, bpk


def resnet_block_light(x_nchw, prepared, *, grid_blocks=None):
    """Forward pass of ResnetBlock_light.  Input/output: NCHW (PyTorch layout).

    `prepared` = prepare_params(raw_params), computed once outside the forward.
    """
    N, C, H, W = x_nchw.shape
    wpk, bpk = prepared
    HW = H * W

    G = grid_blocks if grid_blocks is not None else _default_grid_blocks(N)
    G = max(1, min(G, N))
    while N % G:                               # largest divisor of N <= requested
        G -= 1
    nb = N // G

    xf = x_nchw.reshape(N, C, HW)              # free view: NCHW is channel-major

    # TODO(synk): for production sizes (e.g. 128ch x 256x256 on v7x's 64 MiB VMEM)
    # add a row-tile grid axis with a 2-row recompute halo (tile_rows*W a multiple
    # of 128 lanes) and set vmem_limit_bytes / Buffered(3) per the review; whole-
    # image-per-step blocks are fine at these small shapes.
    yf = pl.pallas_call(
        functools.partial(_resblock_kernel, W=W),
        out_shape=jax.ShapeDtypeStruct((N, C, HW), x_nchw.dtype),
        grid_spec=pltpu.PrefetchScalarGridSpec(
            num_scalar_prefetch=0,
            grid=(G,),
            in_specs=[
                pl.BlockSpec((nb, C, HW), lambda g: (g, 0, 0)),       # x block
                pl.BlockSpec((2, 9, C, C), lambda g: (0, 0, 0, 0)),   # packed tap weights
                pl.BlockSpec((2, C, 1), lambda g: (0, 0, 0)),         # packed biases
            ],
            out_specs=pl.BlockSpec((nb, C, HW), lambda g: (g, 0, 0)),
        ),
        compiler_params=pltpu.CompilerParams(
            dimension_semantics=("parallel",)),
    )(xf, wpk, bpk)
    return yf.reshape(N, C, H, W)


def _reference(x_nchw, params):
    """Pure-JAX reference (lax.conv) for correctness checking."""
    w1, b1, w2, b2 = params
    dn = ("NCHW", "OIHW", "NCHW")

    def conv(x, w, b):
        y = lax.conv_general_dilated(x, w, (1, 1), "SAME", dimension_numbers=dn)
        return y + b[None, :, None, None]

    h = jnp.maximum(conv(x_nchw, w1, b1), 0.0)
    return conv(h, w2, b2) + x_nchw


if __name__ == "__main__":
    N, C, H, W = 2, 4, 16, 16
    key = jax.random.PRNGKey(0)
    kx, kw1, kb1, kw2, kb2 = jax.random.split(key, 5)

    x = jax.random.normal(kx, (N, C, H, W), dtype=jnp.float32)
    params = (
        jax.random.normal(kw1, (C, C, 3, 3), dtype=jnp.float32) * 0.1,
        jax.random.normal(kb1, (C,), dtype=jnp.float32) * 0.1,
        jax.random.normal(kw2, (C, C, 3, 3), dtype=jnp.float32) * 0.1,
        jax.random.normal(kb2, (C,), dtype=jnp.float32) * 0.1,
    )

    fwd = jax.jit(resnet_block_light)
    ref = jax.block_until_ready(_reference(x, params))

    # Exact-tolerance check: f32 matmul operands.
    prepared_f32 = prepare_params(params, mm_dtype=jnp.float32)
    out_f32 = jax.block_until_ready(fwd(x, prepared_f32))
    assert out_f32.shape == (N, C, H, W), out_f32.shape
    assert jnp.allclose(out_f32, ref, atol=1e-4, rtol=1e-4), "f32 path mismatch vs reference"

    # Default production path: bf16 matmul operands (f32 accumulate/epilogue);
    # looser tolerance for expected bf16 quantization of inputs/weights.
    prepared_bf16 = prepare_params(params)
    out_bf16 = jax.block_until_ready(fwd(x, prepared_bf16))
    assert out_bf16.shape == (N, C, H, W), out_bf16.shape
    assert jnp.allclose(out_bf16, ref, atol=1e-1, rtol=1e-1), "bf16 path mismatch vs reference"

    print("KERNEL_OK")
</pallas_src>

<mosaic_0001>
module attributes {stable_mosaic.version = 11 : i64} {
  func.func @_resblock_kernel(%arg0: i32, %arg1: memref<2x4x256xf32, #tpu.memory_space<vmem>>, %arg2: memref<2x9x4x4xf32, #tpu.memory_space<vmem>>, %arg3: memref<2x4x1xf32, #tpu.memory_space<vmem>>, %arg4: memref<2x4x256xf32, #tpu.memory_space<vmem>>) attributes {dimension_semantics = [#tpu.dimension_semantics<parallel>], iteration_bounds = array<i64: 1>, scalar_prefetch = 0 : i64, scratch_operands = 0 : i64, tpu.core_type = #tpu.core_type<tc>, window_params = [{transform_indices = @transform_0, window_bounds = array<i64: 2, 4, 256>}, {pipeline_mode = #tpu.pipeline_mode<synchronous>, transform_indices = @transform_1, window_bounds = array<i64: 2, 9, 4, 4>}, {pipeline_mode = #tpu.pipeline_mode<synchronous>, transform_indices = @transform_2, window_bounds = array<i64: 2, 4, 1>}, {transform_indices = @transform_3, window_bounds = array<i64: 2, 4, 256>}]} {
    %0 = tpu.iota {dimensions = array<i32: 1>} : vector<4x256xi32>
    %c16_i32 = arith.constant 16 : i32
    %c0_i32 = arith.constant 0 : i32
    %1 = arith.cmpi eq, %c16_i32, %c0_i32 : i32
    %c1_i32 = arith.constant 1 : i32
    %2 = arith.select %1, %c1_i32, %c16_i32 : i32
    %3 = vector.broadcast %2 : i32 to vector<4x256xi32>
    %4 = arith.remsi %0, %3 : vector<4x256xi32>
    %c0_i32_0 = arith.constant 0 : i32
    %5 = vector.broadcast %c0_i32_0 : i32 to vector<4x256xi32>
    %6 = arith.cmpi ne, %4, %5 : vector<4x256xi32>
    %c0_i32_1 = arith.constant 0 : i32
    %7 = vector.broadcast %c0_i32_1 : i32 to vector<4x256xi32>
    %8 = arith.cmpi slt, %4, %7 : vector<4x256xi32>
    %c0_i32_2 = arith.constant 0 : i32
    %9 = arith.cmpi slt, %2, %c0_i32_2 : i32
    %10 = vector.broadcast %9 : i1 to vector<4x256xi1>
    %11 = vector.broadcast %10 : vector<4x256xi1> to vector<4x256xi1>
    %12 = arith.xori %8, %11 : vector<4x256xi1>
    %13 = arith.andi %12, %6 : vector<4x256xi1>
    %14 = vector.broadcast %2 : i32 to vector<4x256xi32>
    %15 = arith.addi %4, %14 : vector<4x256xi32>
    %16 = arith.select %13, %15, %4 : vector<4x256xi1>, vector<4x256xi32>
    %c0_i32_3 = arith.constant 0 : i32
    %17 = vector.broadcast %c0_i32_3 : i32 to vector<4x256xi32>
    %18 = arith.cmpi ne, %16, %17 : vector<4x256xi32>
    %19 = arith.extui %18 : vector<4x256xi1> to vector<4x256xi32>
    %20 = arith.sitofp %19 : vector<4x256xi32> to vector<4x256xf32>
    %c15_i32 = arith.constant 15 : i32
    %21 = vector.broadcast %c15_i32 : i32 to vector<4x256xi32>
    %22 = arith.cmpi ne, %16, %21 : vector<4x256xi32>
    %23 = arith.extui %22 : vector<4x256xi1> to vector<4x256xi32>
    %24 = arith.sitofp %23 : vector<4x256xi32> to vector<4x256xf32>
    %c0 = arith.constant 0 : index
    %c0_4 = arith.constant 0 : index
    %c0_5 = arith.constant 0 : index
    %c0_6 = arith.constant 0 : index
    %25 = vector.load %arg2[%c0, %c0_4, %c0_5, %c0_6] : memref<2x9x4x4xf32, #tpu.memory_space<vmem>>, vector<1x1x4x4xf32>
    %26 = vector.shape_cast %25 : vector<1x1x4x4xf32> to vector<4x4xf32>
    %c0_7 = arith.constant 0 : index
    %c1 = arith.constant 1 : index
    %c0_8 = arith.constant 0 : index
    %c0_9 = arith.constant 0 : index
    %27 = vector.load %arg2[%c0_7, %c1, %c0_8, %c0_9] : memref<2x9x4x4xf32, #tpu.memory_space<vmem>>, vector<1x1x4x4xf32>
    %28 = vector.shape_cast %27 : vector<1x1x4x4xf32> to vector<4x4xf32>
    %c0_10 = arith.constant 0 : index
    %c2 = arith.constant 2 : index
    %c0_11 = arith.constant 0 : index
    %c0_12 = arith.constant 0 : index
    %29 = vector.load %arg2[%c0_10, %c2, %c0_11, %c0_12] : memref<2x9x4x4xf32, #tpu.memory_space<vmem>>, vector<1x1x4x4xf32>
    %30 = vector.shape_cast %29 : vector<1x1x4x4xf32> to vector<4x4xf32>
    %c0_13 = arith.constant 0 : index
    %c3 = arith.constant 3 : index
    %c0_14 = arith.constant 0 : index
    %c0_15 = arith.constant 0 : index
    %31 = vector.load %arg2[%c0_13, %c3, %c0_14, %c0_15] : memref<2x9x4x4xf32, #tpu.memory_space<vmem>>, vector<1x1x4x4xf32>
    %32 = vector.shape_cast %31 : vector<1x1x4x4xf32> to vector<4x4xf32>
    %c0_16 = arith.constant 0 : index
    %c4 = arith.constant 4 : index
    %c0_17 = arith.constant 0 : index
    %c0_18 = arith.constant 0 : index
    %33 = vector.load %arg2[%c0_16, %c4, %c0_17, %c0_18] : memref<2x9x4x4xf32, #tpu.memory_space<vmem>>, vector<1x1x4x4xf32>
    %34 = vector.shape_cast %33 : vector<1x1x4x4xf32> to vector<4x4xf32>
    %c0_19 = arith.constant 0 : index
    %c5 = arith.constant 5 : index
    %c0_20 = arith.constant 0 : index
    %c0_21 = arith.constant 0 : index
    %35 = vector.load %arg2[%c0_19, %c5, %c0_20, %c0_21] : memref<2x9x4x4xf32, #tpu.memory_space<vmem>>, vector<1x1x4x4xf32>
    %36 = vector.shape_cast %35 : vector<1x1x4x4xf32> to vector<4x4xf32>
    %c0_22 = arith.constant 0 : index
    %c6 = arith.constant 6 : index
    %c0_23 = arith.constant 0 : index
    %c0_24 = arith.constant 0 : index
    %37 = vector.load %arg2[%c0_22, %c6, %c0_23, %c0_24] : memref<2x9x4x4xf32, #tpu.memory_space<vmem>>, vector<1x1x4x4xf32>
    %38 = vector.shape_cast %37 : vector<1x1x4x4xf32> to vector<4x4xf32>
    %c0_25 = arith.constant 0 : index
    %c7 = arith.constant 7 : index
    %c0_26 = arith.constant 0 : index
    %c0_27 = arith.constant 0 : index
    %39 = vector.load %arg2[%c0_25, %c7, %c0_26, %c0_27] : memref<2x9x4x4xf32, #tpu.memory_space<vmem>>, vector<1x1x4x4xf32>
    %40 = vector.shape_cast %39 : vector<1x1x4x4xf32> to vector<4x4xf32>
    %c0_28 = arith.constant 0 : index
    %c8 = arith.constant 8 : index
    %c0_29 = arith.constant 0 : index
    %c0_30 = arith.constant 0 : index
    %41 = vector.load %arg2[%c0_28, %c8, %c0_29, %c0_30] : memref<2x9x4x4xf32, #tpu.memory_space<vmem>>, vector<1x1x4x4xf32>
    %42 = vector.shape_cast %41 : vector<1x1x4x4xf32> to vector<4x4xf32>
    %c1_31 = arith.constant 1 : index
    %c0_32 = arith.constant 0 : index
    %c0_33 = arith.constant 0 : index
    %c0_34 = arith.constant 0 : index
    %43 = vector.load %arg2[%c1_31, %c0_32, %c0_33, %c0_34] : memref<2x9x4x4xf32, #tpu.memory_space<vmem>>, vector<1x1x4x4xf32>
    %44 = vector.shape_cast %43 : vector<1x1x4x4xf32> to vector<4x4xf32>
    %c1_35 = arith.constant 1 : index
    %c1_36 = arith.constant 1 : index
    %c0_37 = arith.constant 0 : index
    %c0_38 = arith.constant 0 : index
    %45 = vector.load %arg2[%c1_35, %c1_36, %c0_37, %c0_38] : memref<2x9x4x4xf32, #tpu.memory_space<vmem>>, vector<1x1x4x4xf32>
    %46 = vector.shape_cast %45 : vector<1x1x4x4xf32> to vector<4x4xf32>
    %c1_39 = arith.constant 1 : index
    %c2_40 = arith.constant 2 : index
    %c0_41 = arith.constant 0 : index
    %c0_42 = arith.constant 0 : index
    %47 = vector.load %arg2[%c1_39, %c2_40, %c0_41, %c0_42] : memref<2x9x4x4xf32, #tpu.memory_space<vmem>>, vector<1x1x4x4xf32>
    %48 = vector.shape_cast %47 : vector<1x1x4x4xf32> to vector<4x4xf32>
    %c1_43 = arith.constant 1 : index
    %c3_44 = arith.constant 3 : index
    %c0_45 = arith.constant 0 : index
    %c0_46 = arith.constant 0 : index
    %49 = vector.load %arg2[%c1_43, %c3_44, %c0_45, %c0_46] : memref<2x9x4x4xf32, #tpu.memory_space<vmem>>, vector<1x1x4x4xf32>
    %50 = vector.shape_cast %49 : vector<1x1x4x4xf32> to vector<4x4xf32>
    %c1_47 = arith.constant 1 : index
    %c4_48 = arith.constant 4 : index
    %c0_49 = arith.constant 0 : index
    %c0_50 = arith.constant 0 : index
    %51 = vector.load %arg2[%c1_47, %c4_48, %c0_49, %c0_50] : memref<2x9x4x4xf32, #tpu.memory_space<vmem>>, vector<1x1x4x4xf32>
    %52 = vector.shape_cast %51 : vector<1x1x4x4xf32> to vector<4x4xf32>
    %c1_51 = arith.constant 1 : index
    %c5_52 = arith.constant 5 : index
    %c0_53 = arith.constant 0 : index
    %c0_54 = arith.constant 0 : index
    %53 = vector.load %arg2[%c1_51, %c5_52, %c0_53, %c0_54] : memref<2x9x4x4xf32, #tpu.memory_space<vmem>>, vector<1x1x4x4xf32>
    %54 = vector.shape_cast %53 : vector<1x1x4x4xf32> to vector<4x4xf32>
    %c1_55 = arith.constant 1 : index
    %c6_56 = arith.constant 6 : index
    %c0_57 = arith.constant 0 : index
    %c0_58 = arith.constant 0 : index
    %55 = vector.load %arg2[%c1_55, %c6_56, %c0_57, %c0_58] : memref<2x9x4x4xf32, #tpu.memory_space<vmem>>, vector<1x1x4x4xf32>
    %56 = vector.shape_cast %55 : vector<1x1x4x4xf32> to vector<4x4xf32>
    %c1_59 = arith.constant 1 : index
    %c7_60 = arith.constant 7 : index
    %c0_61 = arith.constant 0 : index
    %c0_62 = arith.constant 0 : index
    %57 = vector.load %arg2[%c1_59, %c7_60, %c0_61, %c0_62] : memref<2x9x4x4xf32, #tpu.memory_space<vmem>>, vector<1x1x4x4xf32>
    %58 = vector.shape_cast %57 : vector<1x1x4x4xf32> to vector<4x4xf32>
    %c1_63 = arith.constant 1 : index
    %c8_64 = arith.constant 8 : index
    %c0_65 = arith.constant 0 : index
    %c0_66 = arith.constant 0 : index
    %59 = vector.load %arg2[%c1_63, %c8_64, %c0_65, %c0_66] : memref<2x9x4x4xf32, #tpu.memory_space<vmem>>, vector<1x1x4x4xf32>
    %60 = vector.shape_cast %59 : vector<1x1x4x4xf32> to vector<4x4xf32>
    %c0_67 = arith.constant 0 : index
    %c0_68 = arith.constant 0 : index
    %c0_69 = arith.constant 0 : index
    %61 = vector.load %arg3[%c0_67, %c0_68, %c0_69] : memref<2x4x1xf32, #tpu.memory_space<vmem>>, vector<1x4x1xf32>
    %62 = vector.shape_cast %61 : vector<1x4x1xf32> to vector<4x1xf32>
    %63 = vector.shape_cast %62 : vector<4x1xf32> to vector<4x1xf32>
    %64 = vector.broadcast %63 : vector<4x1xf32> to vector<4x256xf32>
    %c1_70 = arith.constant 1 : index
    %c0_71 = arith.constant 0 : index
    %c0_72 = arith.constant 0 : index
    %65 = vector.load %arg3[%c1_70, %c0_71, %c0_72] : memref<2x4x1xf32, #tpu.memory_space<vmem>>, vector<1x4x1xf32>
    %66 = vector.shape_cast %65 : vector<1x4x1xf32> to vector<4x1xf32>
    %67 = vector.shape_cast %66 : vector<4x1xf32> to vector<4x1xf32>
    %68 = vector.broadcast %67 : vector<4x1xf32> to vector<4x256xf32>
    %c0_73 = arith.constant 0 : index
    %c0_74 = arith.constant 0 : index
    %c0_75 = arith.constant 0 : index
    %69 = vector.load %arg1[%c0_73, %c0_74, %c0_75] : memref<2x4x256xf32, #tpu.memory_space<vmem>>, vector<1x4x256xf32>
    %70 = vector.shape_cast %69 : vector<1x4x256xf32> to vector<4x256xf32>
    %cst = arith.constant 0.000000e+00 : f32
    %71 = vector.broadcast %cst : f32 to vector<4x17xf32>
    %72 = tpu.concatenate %71, %70, %71 in 1 : vector<4x17xf32>, vector<4x256xf32>, vector<4x17xf32> -> vector<4x290xf32>
    %73 = vector.extract_strided_slice %72 {offsets = [0, 0], sizes = [4, 256], strides = [1, 1]} : vector<4x290xf32> to vector<4x256xf32>
    %74 = arith.mulf %73, %20 : vector<4x256xf32>
    %cst_76 = arith.constant dense<0.000000e+00> : vector<4x256xf32>
    %75 = tpu.matmul %26, %74, %cst_76 {dimension_numbers = #tpu.dot_dimension_numbers<[1], [0], [0], [1], [0, 0, 1, 1], [], []>} : vector<4x4xf32>, vector<4x256xf32>, vector<4x256xf32> -> vector<4x256xf32>
    %76 = arith.addf %64, %75 : vector<4x256xf32>
    %77 = vector.extract_strided_slice %72 {offsets = [0, 1], sizes = [4, 256], strides = [1, 1]} : vector<4x290xf32> to vector<4x256xf32>
    %cst_77 = arith.constant dense<0.000000e+00> : vector<4x256xf32>
    %78 = tpu.matmul %28, %77, %cst_77 {dimension_numbers = #tpu.dot_dimension_numbers<[1], [0], [0], [1], [0, 0, 1, 1], [], []>} : vector<4x4xf32>, vector<4x256xf32>, vector<4x256xf32> -> vector<4x256xf32>
    %79 = arith.addf %76, %78 : vector<4x256xf32>
    %80 = vector.extract_strided_slice %72 {offsets = [0, 2], sizes = [4, 256], strides = [1, 1]} : vector<4x290xf32> to vector<4x256xf32>
    %81 = arith.mulf %80, %24 : vector<4x256xf32>
    %cst_78 = arith.constant dense<0.000000e+00> : vector<4x256xf32>
    %82 = tpu.matmul %30, %81, %cst_78 {dimension_numbers = #tpu.dot_dimension_numbers<[1], [0], [0], [1], [0, 0, 1, 1], [], []>} : vector<4x4xf32>, vector<4x256xf32>, vector<4x256xf32> -> vector<4x256xf32>
    %83 = arith.addf %79, %82 : vector<4x256xf32>
    %84 = vector.extract_strided_slice %72 {offsets = [0, 16], sizes = [4, 256], strides = [1, 1]} : vector<4x290xf32> to vector<4x256xf32>
    %85 = arith.mulf %84, %20 : vector<4x256xf32>
    %cst_79 = arith.constant dense<0.000000e+00> : vector<4x256xf32>
    %86 = tpu.matmul %32, %85, %cst_79 {dimension_numbers = #tpu.dot_dimension_numbers<[1], [0], [0], [1], [0, 0, 1, 1], [], []>} : vector<4x4xf32>, vector<4x256xf32>, vector<4x256xf32> -> vector<4x256xf32>
    %87 = arith.addf %83, %86 : vector<4x256xf32>
    %88 = vector.extract_strided_slice %72 {offsets = [0, 17], sizes = [4, 256], strides = [1, 1]} : vector<4x290xf32> to vector<4x256xf32>
    %cst_80 = arith.constant dense<0.000000e+00> : vector<4x256xf32>
    %89 = tpu.matmul %34, %88, %cst_80 {dimension_numbers = #tpu.dot_dimension_numbers<[1], [0], [0], [1], [0, 0, 1, 1], [], []>} : vector<4x4xf32>, vector<4x256xf32>, vector<4x256xf32> -> vector<4x256xf32>
    %90 = arith.addf %87, %89 : vector<4x256xf32>
    %91 = vector.extract_strided_slice %72 {offsets = [0, 18], sizes = [4, 256], strides = [1, 1]} : vector<4x290xf32> to vector<4x256xf32>
    %92 = arith.mulf %91, %24 : vector<4x256xf32>
    %cst_81 = arith.constant dense<0.000000e+00> : vector<4x256xf32>
    %93 = tpu.matmul %36, %92, %cst_81 {dimension_numbers = #tpu.dot_dimension_numbers<[1], [0], [0], [1], [0, 0, 1, 1], [], []>} : vector<4x4xf32>, vector<4x256xf32>, vector<4x256xf32> -> vector<4x256xf32>
    %94 = arith.addf %90, %93 : vector<4x256xf32>
    %95 = vector.extract_strided_slice %72 {offsets = [0, 32], sizes = [4, 256], strides = [1, 1]} : vector<4x290xf32> to vector<4x256xf32>
    %96 = arith.mulf %95, %20 : vector<4x256xf32>
    %cst_82 = arith.constant dense<0.000000e+00> : vector<4x256xf32>
    %97 = tpu.matmul %38, %96, %cst_82 {dimension_numbers = #tpu.dot_dimension_numbers<[1], [0], [0], [1], [0, 0, 1, 1], [], []>} : vector<4x4xf32>, vector<4x256xf32>, vector<4x256xf32> -> vector<4x256xf32>
    %98 = arith.addf %94, %97 : vector<4x256xf32>
    %99 = vector.extract_strided_slice %72 {offsets = [0, 33], sizes = [4, 256], strides = [1, 1]} : vector<4x290xf32> to vector<4x256xf32>
    %cst_83 = arith.constant dense<0.000000e+00> : vector<4x256xf32>
    %100 = tpu.matmul %40, %99, %cst_83 {dimension_numbers = #tpu.dot_dimension_numbers<[1], [0], [0], [1], [0, 0, 1, 1], [], []>} : vector<4x4xf32>, vector<4x256xf32>, vector<4x256xf32> -> vector<4x256xf32>
    %101 = arith.addf %98, %100 : vector<4x256xf32>
    %102 = vector.extract_strided_slice %72 {offsets = [0, 34], sizes = [4, 256], strides = [1, 1]} : vector<4x290xf32> to vector<4x256xf32>
    %103 = arith.mulf %102, %24 : vector<4x256xf32>
    %cst_84 = arith.constant dense<0.000000e+00> : vector<4x256xf32>
    %104 = tpu.matmul %42, %103, %cst_84 {dimension_numbers = #tpu.dot_dimension_numbers<[1], [0], [0], [1], [0, 0, 1, 1], [], []>} : vector<4x4xf32>, vector<4x256xf32>, vector<4x256xf32> -> vector<4x256xf32>
    %105 = arith.addf %101, %104 : vector<4x256xf32>
    %cst_85 = arith.constant 0.000000e+00 : f32
    %106 = vector.broadcast %cst_85 : f32 to vector<4x256xf32>
    %107 = arith.maximumf %105, %106 : vector<4x256xf32>
    %cst_86 = arith.constant 0.000000e+00 : f32
    %108 = vector.broadcast %cst_86 : f32 to vector<4x17xf32>
    %109 = tpu.concatenate %108, %107, %108 in 1 : vector<4x17xf32>, vector<4x256xf32>, vector<4x17xf32> -> vector<4x290xf32>
    %110 = vector.extract_strided_slice %109 {offsets = [0, 0], sizes = [4, 256], strides = [1, 1]} : vector<4x290xf32> to vector<4x256xf32>
    %111 = arith.mulf %110, %20 : vector<4x256xf32>
    %cst_87 = arith.constant dense<0.000000e+00> : vector<4x256xf32>
    %112 = tpu.matmul %44, %111, %cst_87 {dimension_numbers = #tpu.dot_dimension_numbers<[1], [0], [0], [1], [0, 0, 1, 1], [], []>} : vector<4x4xf32>, vector<4x256xf32>, vector<4x256xf32> -> vector<4x256xf32>
    %113 = arith.addf %68, %112 : vector<4x256xf32>
    %114 = vector.extract_strided_slice %109 {offsets = [0, 1], sizes = [4, 256], strides = [1, 1]} : vector<4x290xf32> to vector<4x256xf32>
    %cst_88 = arith.constant dense<0.000000e+00> : vector<4x256xf32>
    %115 = tpu.matmul %46, %114, %cst_88 {dimension_numbers = #tpu.dot_dimension_numbers<[1], [0], [0], [1], [0, 0, 1, 1], [], []>} : vector<4x4xf32>, vector<4x256xf32>, vector<4x256xf32> -> vector<4x256xf32>
    %116 = arith.addf %113, %115 : vector<4x256xf32>
    %117 = vector.extract_strided_slice %109 {offsets = [0, 2], sizes = [4, 256], strides = [1, 1]} : vector<4x290xf32> to vector<4x256xf32>
    %118 = arith.mulf %117, %24 : vector<4x256xf32>
    %cst_89 = arith.constant dense<0.000000e+00> : vector<4x256xf32>
    %119 = tpu.matmul %48, %118, %cst_89 {dimension_numbers = #tpu.dot_dimension_numbers<[1], [0], [0], [1], [0, 0, 1, 1], [], []>} : vector<4x4xf32>, vector<4x256xf32>, vector<4x256xf32> -> vector<4x256xf32>
    %120 = arith.addf %116, %119 : vector<4x256xf32>
    %121 = vector.extract_strided_slice %109 {offsets = [0, 16], sizes = [4, 256], strides = [1, 1]} : vector<4x290xf32> to vector<4x256xf32>
    %122 = arith.mulf %121, %20 : vector<4x256xf32>
    %cst_90 = arith.constant dense<0.000000e+00> : vector<4x256xf32>
    %123 = tpu.matmul %50, %122, %cst_90 {dimension_numbers = #tpu.dot_dimension_numbers<[1], [0], [0], [1], [0, 0, 1, 1], [], []>} : vector<4x4xf32>, vector<4x256xf32>, vector<4x256xf32> -> vector<4x256xf32>
    %124 = arith.addf %120, %123 : vector<4x256xf32>
    %125 = vector.extract_strided_slice %109 {offsets = [0, 17], sizes = [4, 256], strides = [1, 1]} : vector<4x290xf32> to vector<4x256xf32>
    %cst_91 = arith.constant dense<0.000000e+00> : vector<4x256xf32>
    %126 = tpu.matmul %52, %125, %cst_91 {dimension_numbers = #tpu.dot_dimension_numbers<[1], [0], [0], [1], [0, 0, 1, 1], [], []>} : vector<4x4xf32>, vector<4x256xf32>, vector<4x256xf32> -> vector<4x256xf32>
    %127 = arith.addf %124, %126 : vector<4x256xf32>
    %128 = vector.extract_strided_slice %109 {offsets = [0, 18], sizes = [4, 256], strides = [1, 1]} : vector<4x290xf32> to vector<4x256xf32>
    %129 = arith.mulf %128, %24 : vector<4x256xf32>
    %cst_92 = arith.constant dense<0.000000e+00> : vector<4x256xf32>
    %130 = tpu.matmul %54, %129, %cst_92 {dimension_numbers = #tpu.dot_dimension_numbers<[1], [0], [0], [1], [0, 0, 1, 1], [], []>} : vector<4x4xf32>, vector<4x256xf32>, vector<4x256xf32> -> vector<4x256xf32>
    %131 = arith.addf %127, %130 : vector<4x256xf32>
    %132 = vector.extract_strided_slice %109 {offsets = [0, 32], sizes = [4, 256], strides = [1, 1]} : vector<4x290xf32> to vector<4x256xf32>
    %133 = arith.mulf %132, %20 : vector<4x256xf32>
    %cst_93 = arith.constant dense<0.000000e+00> : vector<4x256xf32>
    %134 = tpu.matmul %56, %133, %cst_93 {dimension_numbers = #tpu.dot_dimension_numbers<[1], [0], [0], [1], [0, 0, 1, 1], [], []>} : vector<4x4xf32>, vector<4x256xf32>, vector<4x256xf32> -> vector<4x256xf32>
    %135 = arith.addf %131, %134 : vector<4x256xf32>
    %136 = vector.extract_strided_slice %109 {offsets = [0, 33], sizes = [4, 256], strides = [1, 1]} : vector<4x290xf32> to vector<4x256xf32>
    %cst_94 = arith.constant dense<0.000000e+00> : vector<4x256xf32>
    %137 = tpu.matmul %58, %136, %cst_94 {dimension_numbers = #tpu.dot_dimension_numbers<[1], [0], [0], [1], [0, 0, 1, 1], [], []>} : vector<4x4xf32>, vector<4x256xf32>, vector<4x256xf32> -> vector<4x256xf32>
    %138 = arith.addf %135, %137 : vector<4x256xf32>
    %139 = vector.extract_strided_slice %109 {offsets = [0, 34], sizes = [4, 256], strides = [1, 1]} : vector<4x290xf32> to vector<4x256xf32>
    %140 = arith.mulf %139, %24 : vector<4x256xf32>
    %cst_95 = arith.constant dense<0.000000e+00> : vector<4x256xf32>
    %141 = tpu.matmul %60, %140, %cst_95 {dimension_numbers = #tpu.dot_dimension_numbers<[1], [0], [0], [1], [0, 0, 1, 1], [], []>} : vector<4x4xf32>, vector<4x256xf32>, vector<4x256xf32> -> vector<4x256xf32>
    %142 = arith.addf %138, %141 : vector<4x256xf32>
    %143 = arith.addf %142, %70 : vector<4x256xf32>
    %c0_96 = arith.constant 0 : index
    %c0_97 = arith.constant 0 : index
    %c0_98 = arith.constant 0 : index
    %144 = vector.load %arg4[%c0_96, %c0_97, %c0_98] : memref<2x4x256xf32, #tpu.memory_space<vmem>>, vector<1x4x256xf32>
    %145 = vector.shape_cast %144 : vector<1x4x256xf32> to vector<4x256xf32>
    %146 = vector.shape_cast %143 : vector<4x256xf32> to vector<1x4x256xf32>
    tpu.vector_store %arg4[%c0_96, %c0_97, %c0_98], %146 {strides = array<i32>} : memref<2x4x256xf32, #tpu.memory_space<vmem>>, vector<1x4x256xf32>,
    %c1_99 = arith.constant 1 : index
    %c0_100 = arith.constant 0 : index
    %c0_101 = arith.constant 0 : index
    %147 = vector.load %arg1[%c1_99, %c0_100, %c0_101] : memref<2x4x256xf32, #tpu.memory_space<vmem>>, vector<1x4x256xf32>
    %148 = vector.shape_cast %147 : vector<1x4x256xf32> to vector<4x256xf32>
    %cst_102 = arith.constant 0.000000e+00 : f32
    %149 = vector.broadcast %cst_102 : f32 to vector<4x17xf32>
    %150 = tpu.concatenate %149, %148, %149 in 1 : vector<4x17xf32>, vector<4x256xf32>, vector<4x17xf32> -> vector<4x290xf32>
    %151 = vector.extract_strided_slice %150 {offsets = [0, 0], sizes = [4, 256], strides = [1, 1]} : vector<4x290xf32> to vector<4x256xf32>
    %152 = arith.mulf %151, %20 : vector<4x256xf32>
    %cst_103 = arith.constant dense<0.000000e+00> : vector<4x256xf32>
    %153 = tpu.matmul %26, %152, %cst_103 {dimension_numbers = #tpu.dot_dimension_numbers<[1], [0], [0], [1], [0, 0, 1, 1], [], []>} : vector<4x4xf32>, vector<4x256xf32>, vector<4x256xf32> -> vector<4x256xf32>
    %154 = arith.addf %64, %153 : vector<4x256xf32>
    %155 = vector.extract_strided_slice %150 {offsets = [0, 1], sizes = [4, 256], strides = [1, 1]} : vector<4x290xf32> to vector<4x256xf32>
    %cst_104 = arith.constant dense<0.000000e+00> : vector<4x256xf32>
    %156 = tpu.matmul %28, %155, %cst_104 {dimension_numbers = #tpu.dot_dimension_numbers<[1], [0], [0], [1], [0, 0, 1, 1], [], []>} : vector<4x4xf32>, vector<4x256xf32>, vector<4x256xf32> -> vector<4x256xf32>
    %157 = arith.addf %154, %156 : vector<4x256xf32>
    %158 = vector.extract_strided_slice %150 {offsets = [0, 2], sizes = [4, 256], strides = [1, 1]} : vector<4x290xf32> to vector<4x256xf32>
    %159 = arith.mulf %158, %24 : vector<4x256xf32>
    %cst_105 = arith.constant dense<0.000000e+00> : vector<4x256xf32>
    %160 = tpu.matmul %30, %159, %cst_105 {dimension_numbers = #tpu.dot_dimension_numbers<[1], [0], [0], [1], [0, 0, 1, 1], [], []>} : vector<4x4xf32>, vector<4x256xf32>, vector<4x256xf32> -> vector<4x256xf32>
    %161 = arith.addf %157, %160 : vector<4x256xf32>
    %162 = vector.extract_strided_slice %150 {offsets = [0, 16], sizes = [4, 256], strides = [1, 1]} : vector<4x290xf32> to vector<4x256xf32>
    %163 = arith.mulf %162, %20 : vector<4x256xf32>
    %cst_106 = arith.constant dense<0.000000e+00> : vector<4x256xf32>
    %164 = tpu.matmul %32, %163, %cst_106 {dimension_numbers = #tpu.dot_dimension_numbers<[1], [0], [0], [1], [0, 0, 1, 1], [], []>} : vector<4x4xf32>, vector<4x256xf32>, vector<4x256xf32> -> vector<4x256xf32>
    %165 = arith.addf %161, %164 : vector<4x256xf32>
    %166 = vector.extract_strided_slice %150 {offsets = [0, 17], sizes = [4, 256], strides = [1, 1]} : vector<4x290xf32> to vector<4x256xf32>
    %cst_107 = arith.constant dense<0.000000e+00> : vector<4x256xf32>
    %167 = tpu.matmul %34, %166, %cst_107 {dimension_numbers = #tpu.dot_dimension_numbers<[1], [0], [0], [1], [0, 0, 1, 1], [], []>} : vector<4x4xf32>, vector<4x256xf32>, vector<4x256xf32> -> vector<4x256xf32>
    %168 = arith.addf %165, %167 : vector<4x256xf32>
    %169 = vector.extract_strided_slice %150 {offsets = [0, 18], sizes = [4, 256], strides = [1, 1]} : vector<4x290xf32> to vector<4x256xf32>
    %170 = arith.mulf %169, %24 : vector<4x256xf32>
    %cst_108 = arith.constant dense<0.000000e+00> : vector<4x256xf32>
    %171 = tpu.matmul %36, %170, %cst_108 {dimension_numbers = #tpu.dot_dimension_numbers<[1], [0], [0], [1], [0, 0, 1, 1], [], []>} : vector<4x4xf32>, vector<4x256xf32>, vector<4x256xf32> -> vector<4x256xf32>
    %172 = arith.addf %168, %171 : vector<4x256xf32>
    %173 = vector.extract_strided_slice %150 {offsets = [0, 32], sizes = [4, 256], strides = [1, 1]} : vector<4x290xf32> to vector<4x256xf32>
    %174 = arith.mulf %173, %20 : vector<4x256xf32>
    %cst_109 = arith.constant dense<0.000000e+00> : vector<4x256xf32>
    %175 = tpu.matmul %38, %174, %cst_109 {dimension_numbers = #tpu.dot_dimension_numbers<[1], [0], [0], [1], [0, 0, 1, 1], [], []>} : vector<4x4xf32>, vector<4x256xf32>, vector<4x256xf32> -> vector<4x256xf32>
    %176 = arith.addf %172, %175 : vector<4x256xf32>
    %177 = vector.extract_strided_slice %150 {offsets = [0, 33], sizes = [4, 256], strides = [1, 1]} : vector<4x290xf32> to vector<4x256xf32>
    %cst_110 = arith.constant dense<0.000000e+00> : vector<4x256xf32>
    %178 = tpu.matmul %40, %177, %cst_110 {dimension_numbers = #tpu.dot_dimension_numbers<[1], [0], [0], [1], [0, 0, 1, 1], [], []>} : vector<4x4xf32>, vector<4x256xf32>, vector<4x256xf32> -> vector<4x256xf32>
    %179 = arith.addf %176, %178 : vector<4x256xf32>
    %180 = vector.extract_strided_slice %150 {offsets = [0, 34], sizes = [4, 256], strides = [1, 1]} : vector<4x290xf32> to vector<4x256xf32>
    %181 = arith.mulf %180, %24 : vector<4x256xf32>
    %cst_111 = arith.constant dense<0.000000e+00> : vector<4x256xf32>
    %182 = tpu.matmul %42, %181, %cst_111 {dimension_numbers = #tpu.dot_dimension_numbers<[1], [0], [0], [1], [0, 0, 1, 1], [], []>} : vector<4x4xf32>, vector<4x256xf32>, vector<4x256xf32> -> vector<4x256xf32>
    %183 = arith.addf %179, %182 : vector<4x256xf32>
    %cst_112 = arith.constant 0.000000e+00 : f32
    %184 = vector.broadcast %cst_112 : f32 to vector<4x256xf32>
    %185 = arith.maximumf %183, %184 : vector<4x256xf32>
    %cst_113 = arith.constant 0.000000e+00 : f32
    %186 = vector.broadcast %cst_113 : f32 to vector<4x17xf32>
    %187 = tpu.concatenate %186, %185, %186 in 1 : vector<4x17xf32>, vector<4x256xf32>, vector<4x17xf32> -> vector<4x290xf32>
    %188 = vector.extract_strided_slice %187 {offsets = [0, 0], sizes = [4, 256], strides = [1, 1]} : vector<4x290xf32> to vector<4x256xf32>
    %189 = arith.mulf %188, %20 : vector<4x256xf32>
    %cst_114 = arith.constant dense<0.000000e+00> : vector<4x256xf32>
    %190 = tpu.matmul %44, %189, %cst_114 {dimension_numbers = #tpu.dot_dimension_numbers<[1], [0], [0], [1], [0, 0, 1, 1], [], []>} : vector<4x4xf32>, vector<4x256xf32>, vector<4x256xf32> -> vector<4x256xf32>
    %191 = arith.addf %68, %190 : vector<4x256xf32>
    %192 = vector.extract_strided_slice %187 {offsets = [0, 1], sizes = [4, 256], strides = [1, 1]} : vector<4x290xf32> to vector<4x256xf32>
    %cst_115 = arith.constant dense<0.000000e+00> : vector<4x256xf32>
    %193 = tpu.matmul %46, %192, %cst_115 {dimension_numbers = #tpu.dot_dimension_numbers<[1], [0], [0], [1], [0, 0, 1, 1], [], []>} : vector<4x4xf32>, vector<4x256xf32>, vector<4x256xf32> -> vector<4x256xf32>
    %194 = arith.addf %191, %193 : vector<4x256xf32>
    %195 = vector.extract_strided_slice %187 {offsets = [0, 2], sizes = [4, 256], strides = [1, 1]} : vector<4x290xf32> to vector<4x256xf32>
    %196 = arith.mulf %195, %24 : vector<4x256xf32>
    %cst_116 = arith.constant dense<0.000000e+00> : vector<4x256xf32>
    %197 = tpu.matmul %48, %196, %cst_116 {dimension_numbers = #tpu.dot_dimension_numbers<[1], [0], [0], [1], [0, 0, 1, 1], [], []>} : vector<4x4xf32>, vector<4x256xf32>, vector<4x256xf32> -> vector<4x256xf32>
    %198 = arith.addf %194, %197 : vector<4x256xf32>
    %199 = vector.extract_strided_slice %187 {offsets = [0, 16], sizes = [4, 256], strides = [1, 1]} : vector<4x290xf32> to vector<4x256xf32>
    %200 = arith.mulf %199, %20 : vector<4x256xf32>
    %cst_117 = arith.constant dense<0.000000e+00> : vector<4x256xf32>
    %201 = tpu.matmul %50, %200, %cst_117 {dimension_numbers = #tpu.dot_dimension_numbers<[1], [0], [0], [1], [0, 0, 1, 1], [], []>} : vector<4x4xf32>, vector<4x256xf32>, vector<4x256xf32> -> vector<4x256xf32>
    %202 = arith.addf %198, %201 : vector<4x256xf32>
    %203 = vector.extract_strided_slice %187 {offsets = [0, 17], sizes = [4, 256], strides = [1, 1]} : vector<4x290xf32> to vector<4x256xf32>
    %cst_118 = arith.constant dense<0.000000e+00> : vector<4x256xf32>
    %204 = tpu.matmul %52, %203, %cst_118 {dimension_numbers = #tpu.dot_dimension_numbers<[1], [0], [0], [1], [0, 0, 1, 1], [], []>} : vector<4x4xf32>, vector<4x256xf32>, vector<4x256xf32> -> vector<4x256xf32>
    %205 = arith.addf %202, %204 : vector<4x256xf32>
    %206 = vector.extract_strided_slice %187 {offsets = [0, 18], sizes = [4, 256], strides = [1, 1]} : vector<4x290xf32> to vector<4x256xf32>
    %207 = arith.mulf %206, %24 : vector<4x256xf32>
    %cst_119 = arith.constant dense<0.000000e+00> : vector<4x256xf32>
    %208 = tpu.matmul %54, %207, %cst_119 {dimension_numbers = #tpu.dot_dimension_numbers<[1], [0], [0], [1], [0, 0, 1, 1], [], []>} : vector<4x4xf32>, vector<4x256xf32>, vector<4x256xf32> -> vector<4x256xf32>
    %209 = arith.addf %205, %208 : vector<4x256xf32>
    %210 = vector.extract_strided_slice %187 {offsets = [0, 32], sizes = [4, 256], strides = [1, 1]} : vector<4x290xf32> to vector<4x256xf32>
    %211 = arith.mulf %210, %20 : vector<4x256xf32>
    %cst_120 = arith.constant dense<0.000000e+00> : vector<4x256xf32>
    %212 = tpu.matmul %56, %211, %cst_120 {dimension_numbers = #tpu.dot_dimension_numbers<[1], [0], [0], [1], [0, 0, 1, 1], [], []>} : vector<4x4xf32>, vector<4x256xf32>, vector<4x256xf32> -> vector<4x256xf32>
    %213 = arith.addf %209, %212 : vector<4x256xf32>
    %214 = vector.extract_strided_slice %187 {offsets = [0, 33], sizes = [4, 256], strides = [1, 1]} : vector<4x290xf32> to vector<4x256xf32>
    %cst_121 = arith.constant dense<0.000000e+00> : vector<4x256xf32>
    %215 = tpu.matmul %58, %214, %cst_121 {dimension_numbers = #tpu.dot_dimension_numbers<[1], [0], [0], [1], [0, 0, 1, 1], [], []>} : vector<4x4xf32>, vector<4x256xf32>, vector<4x256xf32> -> vector<4x256xf32>
    %216 = arith.addf %213, %215 : vector<4x256xf32>
    %217 = vector.extract_strided_slice %187 {offsets = [0, 34], sizes = [4, 256], strides = [1, 1]} : vector<4x290xf32> to vector<4x256xf32>
    %218 = arith.mulf %217, %24 : vector<4x256xf32>
    %cst_122 = arith.constant dense<0.000000e+00> : vector<4x256xf32>
    %219 = tpu.matmul %60, %218, %cst_122 {dimension_numbers = #tpu.dot_dimension_numbers<[1], [0], [0], [1], [0, 0, 1, 1], [], []>} : vector<4x4xf32>, vector<4x256xf32>, vector<4x256xf32> -> vector<4x256xf32>
    %220 = arith.addf %216, %219 : vector<4x256xf32>
    %221 = arith.addf %220, %148 : vector<4x256xf32>
    %c1_123 = arith.constant 1 : index
    %c0_124 = arith.constant 0 : index
    %c0_125 = arith.constant 0 : index
    %222 = vector.load %arg4[%c1_123, %c0_124, %c0_125] : memref<2x4x256xf32, #tpu.memory_space<vmem>>, vector<1x4x256xf32>
    %223 = vector.shape_cast %222 : vector<1x4x256xf32> to vector<4x256xf32>
    %224 = vector.shape_cast %221 : vector<4x256xf32> to vector<1x4x256xf32>
    tpu.vector_store %arg4[%c1_123, %c0_124, %c0_125], %224 {strides = array<i32>} : memref<2x4x256xf32, #tpu.memory_space<vmem>>, vector<1x4x256xf32>,
    return
  }
  func.func @transform_0(%arg0: i32) -> (i32, i32, i32) {
    %c0_i32 = arith.constant 0 : i32
    %c0_i32_0 = arith.constant 0 : i32
    %c0_i32_1 = arith.constant 0 : i32
    return %arg0, %c0_i32, %c0_i32_0 : i32, i32, i32
  }
  func.func @transform_1(%arg0: i32) -> (i32, i32, i32, i32) {
    %c0_i32 = arith.constant 0 : i32
    %c0_i32_0 = arith.constant 0 : i32
    %c0_i32_1 = arith.constant 0 : i32
    %c0_i32_2 = arith.constant 0 : i32
    %c0_i32_3 = arith.constant 0 : i32
    return %c0_i32, %c0_i32_0, %c0_i32_1, %c0_i32_2 : i32, i32, i32, i32
  }
  func.func @transform_2(%arg0: i32) -> (i32, i32, i32) {
    %c0_i32 = arith.constant 0 : i32
    %c0_i32_0 = arith.constant 0 : i32
    %c0_i32_1 = arith.constant 0 : i32
    %c0_i32_2 = arith.constant 0 : i32
    return %c0_i32, %c0_i32_0, %c0_i32_1 : i32, i32, i32
  }
  func.func @transform_3(%arg0: i32) -> (i32, i32, i32) {
    %c0_i32 = arith.constant 0 : i32
    %c0_i32_0 = arith.constant 0 : i32
    %c0_i32_1 = arith.constant 0 : i32
    return %arg0, %c0_i32, %c0_i32_0 : i32, i32, i32
  }
}

</mosaic_0001>

<bundles_post_ra>
// kernel: resnet_block_light.1
= control target key start
LH: loop header
LB: loop body
LE: loop exit
PB: predicated region body
PF: predicated region fallthrough
CT: control target
= control target key end

     0   :  { %v14_v0 = vlaneseq  ;;  %v2573_v6 = vmov 0.0   ;;  %s2574_s14 = smov 17   ;;  %s2575_s15 = smov 2   ;;  %vm110_vm4 = vcmask 138240   ;;  %vm123_vm5 = vcmask 1043456   ;;  %s3389_s0 = inlined_call_operand.vmem [shape: f32[2,4,256], index: 0, kind: input, shape index: {}]   ;;  %s3390_s2 = inlined_call_operand.vmem [shape: f32[2,4,1], index: 2, kind: input, shape index: {}]   ;;  %s3391_s1 = inlined_call_operand.vmem [shape: f32[2,9,4,4], index: 1, kind: input, shape index: {}]   ;;  %s3392_s3 = inlined_call_operand.vmem [shape: f32[2,4,256], index: 3, kind: output, shape index: {}]  }
   0x1   :  { %v101_v1 = vld [vmem:[%s3389_s0] sm:$0xff]  ;;  %s2576_s16 = smov 18   ;;  %v2620_v14 = vld [vmem:[%s3389_s0 + $0x8] sm:$0xff]  ;;  %s2577_s19 = smov 16   ;;  %vm238_vm6 = vcmask 15360   ;;  %v2584_v31 = vmov 0  }
   0x2   :  { %103 = vst [vmem:[#allocation1] ss:$2 sm:$0xff] %v101_v1  ;;  %v15_v2 = vand.u32 127, %v14_v0  ;;  %s2578_s20 = smov 32   ;;  %s2579_s21 = smov 34   ;;  %2570 = vset.pattern.permute.xlu1 %v2584_v31  ;;  %2571 = vset.pattern.permute.xlu2 %v2584_v31  ;;  %vm313_vm7 = vcmask 130048  }
   0x3   :  { %s2580_s0 = smov 127   ;;  %s2581_s22 = smov 111   ;;  %2572 = vset.pattern.permute.xlu0 %v2584_v31  ;;  %vm444_vm8 = vcmask 146432   ;;  %vm517_vm9 = vcmask 261120   ;;  %vm648_vm10 = vcmask 277504   ;;  %vm119_vm11 = vcmask 31744  }
   0x4   :  { %v16_v3 = vadd.s32 128, %v15_v2  ;;  %v21_v4 = vand.u32 15, %v15_v2  ;;  %s2582_s23 = smov 95   ;;  %s2583_s24 = smov 126   ;;  %v88_v61 = vld [vmem:[%s3390_s2] sm:$0xf] }
   0x5   :  { %s2585_s25 = smov 112   ;;  %s2586_s26 = smov 110   ;;  %v2757_v2 = vld [vmem:[%s3391_s1] sm:$0xf]  ;;  %vm180_vm12 = vcmask 1039360   ;;  %vm255_vm13 = vcmask 1031168  }
   0x6   :  { %v28_v5 = vand.u32 15, %v16_v3  ;;  %vm47_vm0 = vcmp.ne.s32.totalorder %v21_v4, 15  ;;  %vm41_vm2 = vcmp.ne.s32.totalorder %v21_v4, 0  ;;  %s2587_s27 = smov 96   ;;  %s2588_s28 = smov 94   ;;  %vm388_vm14 = vcmask 908288  }
   0x7   :  { %v2363_v7 = vsel %vm47_vm0, 1.0, %v2573_v6  ;;  %v2613_v12 = vsel %vm41_vm2, 1.0, %v2573_v6  ;;  %v2766_v4 = vld [vmem:[%s3391_s1 + $0x4] sm:$0xf]  ;;  %vm330_vm15 = vcmask 916480   ;;  %vm461_vm0 = vcmask 900096  }
   0x8   :  { %vm48_vm1 = vcmp.ne.s32.totalorder %v28_v5, 15  ;;  %vm42_vm3 = vcmp.ne.s32.totalorder %v28_v5, 0  ;;  %vm534_vm2 = vcmask 785408  }
   0x9   :  { %v104_v8 = vld.sshfl [vmem:[#allocation1] sm:$0xff pattern:$0x75316420]  ;;  %v2364_v9 = vsel %vm48_vm1, 1.0, %v2573_v6  ;;  %v2615_v13 = vsel %vm42_vm3, 1.0, %v2573_v6  ;;  %vm592_vm1 = vcmask 777216  }
   0xa   :  { %106 = vrot.lane.b32.xlu0 %v104_v8, %s2574_s14  ;;  %v2545_v10 = vpack.i.bf16 %v2364_v9, %v2363_v7  ;;  %v105_v11 = vld.sshfl [vmem:[#allocation1 + $0x8] sm:$0xff pattern:$0x75316420]  ;;  %v2550_v15 = vpack.i.bf16 %v2615_v13, %v2613_v12  ;;  %vm665_vm3 = vcmask 769024  }
   0xb   :  { %1272 = vst [vmem:[#allocation1] ss:$2 sm:$0xff] %v101_v1 }
   0xc   :  { %2546 = vrot.lane.b32.xlu1 %v2545_v10, %s2575_s15  ;;  %2556 = vrot.lane.b32.xlu2 %v2545_v10, %s2576_s16 }
  0x12   :  { %108 = vrot.lane.b32.xlu0 %v105_v11, %s2574_s14  ;;  %v2625_v16 = vld.sshfl [vmem:[#allocation1] sm:$0xff pattern:$0x75316420]  ;;  %v2627_v17 = vld.sshfl [vmem:[#allocation1 + $0x8] sm:$0xff pattern:$0x75316420] }
  0x13   :  { %3395 = vst [vmem:[#allocation2_spill] sm:$0xff] %v2625_v16 }
  0x14   :  { %3396 = vst [vmem:[#allocation3_spill] sm:$0xff] %v2627_v17  ;;  %2551 = vrot.lane.b32.xlu1 %v2550_v15, %s2577_s19  ;;  %2561 = vrot.lane.b32.xlu2 %v2550_v15, %s2578_s20 }
  0x15   :  { %1288 = vst [vmem:[#allocation1] ss:$2 sm:$0xff] %v2620_v14 }
  0x1a   :  { %2566 = vrot.lane.b32.xlu0 %v2545_v10, %s2579_s21 }
  0x1c   :  { %v1290_v45 = vld.sshfl [vmem:[#allocation1 + $0x8] sm:$0xff pattern:$0x75316420]  ;;  %v1289_v46 = vld.sshfl [vmem:[#allocation1] sm:$0xff pattern:$0x75316420] }
  0x1d   :  { %2343 = vst [vmem:[#allocation1] ss:$2 sm:$0xff] %v2620_v14 }
  0x66   :  { %v2557_v33 = vpop.permute.xlu2 %2556 }
  0x67   :  { %v2687_v38 = vunpack.i.l.bf16 %v2557_v33  ;;  %v2699_v44 = vunpack.i.h.bf16 %v2557_v33 }
  0x69   :  { %v2709_v48 = vsel %vm444_vm8, %v2687_v38, %v2699_v44 }
  0x6e   :  { %v2562_v42 = vpop.permute.xlu2 %2561 }
  0x6f   :  { %v2704_v47 = vunpack.i.l.bf16 %v2562_v42  ;;  %v2717_v53 = vunpack.i.h.bf16 %v2562_v42 }
  0x71   :  { %v2726_v55 = vsel %vm517_vm9, %v2704_v47, %v2717_v53 }
  0x7c   :  { %v107_v18 = vpop.permute.xlu0 %106 }
  0x7d   :  { %v2631_v19 = vsel %vm110_vm4, 0.0, %v107_v18 }
  0x7e   :  { %174 = vrot.lane.b32.xlu1 %v2631_v19, %s2580_s0  ;;  %v117_v20 = vmul.f32 %v2613_v12, %v2631_v19  ;;  %v2547_v25 = vpop.permute.xlu1 %2546  ;;  %v449_v40 = vmul.f32 %v2687_v38, %v2631_v19  ;;  %v522_v49 = vmul.f32 %v2704_v47, %v2631_v19 }
  0x7f   :  { %v2659_v26 = vunpack.i.l.bf16 %v2547_v25  ;;  %v2663_v29 = vunpack.i.h.bf16 %v2547_v25 }
  0x80   :  { %2383 = vmatpush.msk.msra.mxu0 %vm123_vm5, %v117_v20 }
  0x81   :  { %v243_v27 = vmul.f32 %v2659_v26, %v2631_v19  ;;  %v2674_v32 = vsel %vm238_vm6, %v2659_v26, %v2663_v29  ;;  %2384 = vmatmul.msk.f32.vlgmr.msra.gmra.mxu0 %vm119_vm11, %v2757_v2 }
  0x84   :  { %v109_v21 = vpop.permute.xlu0 %108 }
  0x85   :  { %v2639_v22 = vsel %vm110_vm4, %v107_v18, %v109_v21  ;;  %v2642_v23 = vsel %vm110_vm4, %v109_v21, 0.0 }
  0x86   :  { %382 = vrot.lane.b32.xlu1 %v2631_v19, %s2581_s22  ;;  %178 = vrot.lane.b32.xlu0 %v2642_v23, %s2580_s0  ;;  %v118_v24 = vmul.f32 %v2615_v13, %v2639_v22  ;;  %v2552_v28 = vpop.permute.xlu1 %2551  ;;  %v245_v35 = vmul.f32 %v2663_v29, %v2642_v23  ;;  %v244_v36 = vmul.f32 %v2674_v32, %v2639_v22 }
  0x87   :  { %176 = vrot.lane.b32.xlu2 %v2639_v22, %s2580_s0  ;;  %v2670_v30 = vunpack.i.l.bf16 %v2552_v28  ;;  %v2682_v37 = vunpack.i.h.bf16 %v2552_v28  ;;  %v451_v50 = vmul.f32 %v2699_v44, %v2642_v23  ;;  %v450_v52 = vmul.f32 %v2709_v48, %v2639_v22 }
  0x88   :  { %2385 = vmatpush.msk.msra.mxu1 %vm123_vm5, %v118_v24  ;;  %v524_v56 = vmul.f32 %v2717_v53, %v2642_v23  ;;  %v523_v58 = vmul.f32 %v2726_v55, %v2639_v22 }
  0x89   :  { %v318_v34 = vmul.f32 %v2670_v30, %v2631_v19  ;;  %v2691_v39 = vsel %vm313_vm7, %v2670_v30, %v2682_v37  ;;  %v320_v41 = vmul.f32 %v2682_v37, %v2642_v23  ;;  %2386 = vmatmul.msk.f32.vlgmr.msra.gmra.mxu1 %vm119_vm11, %v2757_v2 }
  0x8a   :  { %v319_v43 = vmul.f32 %v2691_v39, %v2639_v22 }
  0x8c   :  { %v2567_v51 = vpop.permute.xlu0 %2566 }
  0x8d   :  { %v2722_v54 = vunpack.i.l.bf16 %v2567_v51  ;;  %v2734_v59 = vunpack.i.h.bf16 %v2567_v51 }
  0x8e   :  { %586 = vrot.lane.b32.xlu1 %v2631_v19, %s2582_s23  ;;  %386 = vrot.lane.b32.xlu0 %v2642_v23, %s2581_s22 }
  0x8f   :  { %384 = vrot.lane.b32.xlu2 %v2639_v22, %s2581_s22  ;;  %v653_v57 = vmul.f32 %v2722_v54, %v2631_v19  ;;  %v2741_v60 = vsel %vm648_vm10, %v2722_v54, %v2734_v59  ;;  %v655_v62 = vmul.f32 %v2734_v59, %v2642_v23 }
  0x90   :  { %v654_v63 = vmul.f32 %v2741_v60, %v2639_v22 }
  0x96   :  { %249 = vrot.lane.b32.xlu1 %v243_v27, %s2583_s24  ;;  %590 = vrot.lane.b32.xlu0 %v2642_v23, %s2582_s23  ;;  %v2792_v27 = vld [vmem:[%s3391_s1 + $0xc] sm:$0xf] }
  0x97   :  { %588 = vrot.lane.b32.xlu2 %v2639_v22, %s2582_s23  ;;  %v2782_v22 = vld [vmem:[%s3391_s1 + $0x8] sm:$0xf] }
  0x9e   :  { %324 = vrot.lane.b32.xlu1 %v318_v34, %s2585_s25  ;;  %253 = vrot.lane.b32.xlu0 %v245_v35, %s2583_s24  ;;  %v2799_v34 = vld [vmem:[%s3391_s1 + $0x10] sm:$0xf] }
  0x9f   :  { %251 = vrot.lane.b32.xlu2 %v244_v36, %s2583_s24 }
  0xa6   :  { %455 = vrot.lane.b32.xlu1 %v449_v40, %s2586_s26  ;;  %328 = vrot.lane.b32.xlu0 %v320_v41, %s2585_s25  ;;  %v2814_v41 = vld [vmem:[%s3391_s1 + $0x14] sm:$0xf] }
  0xa7   :  { %326 = vrot.lane.b32.xlu2 %v319_v43, %s2585_s25 }
  0xae   :  { %528 = vrot.lane.b32.xlu1 %v522_v49, %s2587_s27  ;;  %459 = vrot.lane.b32.xlu0 %v451_v50, %s2586_s26 }
  0xaf   :  { %457 = vrot.lane.b32.xlu2 %v450_v52, %s2586_s26 }
  0xb6   :  { %532 = vrot.lane.b32.xlu0 %v524_v56, %s2587_s27  ;;  %659 = vrot.lane.b32.xlu1 %v653_v57, %s2588_s28  ;;  %v2834_v57 = vld [vmem:[%s3391_s1 + $0x18] sm:$0xf] }
  0xb7   :  { %530 = vrot.lane.b32.xlu2 %v523_v58, %s2587_s27  ;;  %v2839_v58 = vld [vmem:[%s3391_s1 + $0x1c] sm:$0xf] }
  0xbe   :  { %663 = vrot.lane.b32.xlu0 %v655_v62, %s2588_s28  ;;  %91 = vperm.xlu1 %2570, %v88_v61  }
  0xbf   :  { %661 = vrot.lane.b32.xlu2 %v654_v63, %s2588_s28 }
  0xc6   :  { %1291 = vrot.lane.b32.xlu1 %v1289_v46, %s2574_s14 }
  0xc7   :  { %1293 = vrot.lane.b32.xlu2 %v1290_v45, %s2574_s14 }
  0xe1   :  { %v177_v0 = vpop.permute.xlu2 %176 }
  0xe9   :  { %v385_v1 = vpop.permute.xlu2 %384 }
  0xf0   :  { %v175_v3 = vpop.permute.xlu1 %174 }
  0xf1   :  { %v2768_v5 = vpop.permute.xlu2 %588  ;;  %v181_v6 = vsel %vm180_vm12, %v175_v3, %v177_v0 }
  0xf2   :  { %2387 = vmatpush.msk.msra.mxu2 %vm123_vm5, %v181_v6 }
  0xf3   :  { %2388 = vmatmul.msk.f32.vlgmr.msra.gmra.mxu2 %vm119_vm11, %v2766_v4 }
  0xf8   :  { %v383_v7 = vpop.permute.xlu1 %382  ;;  %v179_v8 = vpop.permute.xlu0 %178 }
  0xf9   :  { %v252_v9 = vpop.permute.xlu2 %251  ;;  %v182_v10 = vsel %vm180_vm12, %v177_v0, %v179_v8  ;;  %v389_v23 = vsel %vm388_vm14, %v383_v7, %v385_v1 }
  0xfa   :  { %2389 = vmatpush.msk.msra.mxu3 %vm123_vm5, %v182_v10 }
  0xfb   :  { %2390 = vmatmul.msk.f32.vlgmr.msra.gmra.mxu3 %vm119_vm11, %v2766_v4 }
 0x100   :  { %v587_v11 = vpop.permute.xlu1 %586  ;;  %v387_v14 = vpop.permute.xlu0 %386 }
 0x101   :  { %v327_v15 = vpop.permute.xlu2 %326  ;;  %v390_v35 = vsel %vm388_vm14, %v385_v1, %v387_v14  ;;  %v593_v46 = vsel %vm592_vm1, %v587_v11, %v2768_v5 }
 0x108   :  { %v250_v18 = vpop.permute.xlu1 %249  ;;  %v591_v19 = vpop.permute.xlu0 %590 }
 0x109   :  { %v458_v20 = vpop.permute.xlu2 %457  ;;  %v256_v21 = vsel %vm255_vm13, %v250_v18, %v252_v9  ;;  %v594_v62 = vsel %vm592_vm1, %v2768_v5, %v591_v19  ;;  %v2864_v5 = vld [vmem:[%s3391_s1 + $0x20] sm:$0xf] }
 0x10a   :  { %2391 = vmatpush.msk.msrb.mxu0 %vm123_vm5, %v256_v21  ;;  %v167_v21 = vpop.f32.mrf.mxu1 }
 0x10b   :  { %2392 = vmatmul.msk.f32.vlgmr.msrb.gmra.mxu0 %vm119_vm11, %v2782_v22 }
 0x10c   :  { %2399 = vmatpush.msk.msra.mxu0 %vm123_vm5, %v389_v23 }
 0x110   :  { %v325_v24 = vpop.permute.xlu1 %324  ;;  %v254_v25 = vpop.permute.xlu0 %253 }
 0x111   :  { %v531_v28 = vpop.permute.xlu2 %530  ;;  %v257_v31 = vsel %vm255_vm13, %v252_v9, %v254_v25  ;;  %v331_v33 = vsel %vm330_vm15, %v325_v24, %v327_v15 }
 0x112   :  { %2393 = vmatpush.msk.msrb.mxu1 %vm123_vm5, %v257_v31  ;;  %2395 = vmatpush.msk.msrb.mxu2 %vm123_vm5, %v331_v33 }
 0x113   :  { %2396 = vmatmul.msk.f32.vlgmr.msrb.gmra.mxu2 %vm119_vm11, %v2792_v27  ;;  %2394 = vmatmul.msk.f32.vlgmr.msrb.gmra.mxu1 %vm119_vm11, %v2782_v22 }
 0x114   :  { %2401 = vmatpush.msk.msra.mxu1 %vm123_vm5, %v390_v35  ;;  %2400 = vmatmul.msk.f32.vlgmr.msra.gmra.mxu0 %vm119_vm11, %v2799_v34 }
 0x118   :  { %v456_v36 = vpop.permute.xlu1 %455  ;;  %v329_v40 = vpop.permute.xlu0 %328 }
 0x119   :  { %v462_v42 = vsel %vm461_vm0, %v456_v36, %v458_v20  ;;  %v662_v43 = vpop.permute.xlu2 %661  ;;  %v332_v45 = vsel %vm330_vm15, %v327_v15, %v329_v40 }
 0x11a   :  { %2397 = vmatpush.msk.msrb.mxu3 %vm123_vm5, %v332_v45  ;;  %2403 = vmatpush.msk.msra.mxu2 %vm123_vm5, %v462_v42 }
 0x11b   :  { %2398 = vmatmul.msk.f32.vlgmr.msrb.gmra.mxu3 %vm119_vm11, %v2792_v27  ;;  %2404 = vmatmul.msk.f32.vlgmr.msra.gmra.mxu2 %vm119_vm11, %v2814_v41 }
 0x11c   :  { %2411 = vmatpush.msk.msrb.mxu2 %vm123_vm5, %v593_v46  ;;  %2402 = vmatmul.msk.f32.vlgmr.msra.gmra.mxu1 %vm119_vm11, %v2799_v34 }
 0x120   :  { %v529_v49 = vpop.permute.xlu1 %528  ;;  %v460_v50 = vpop.permute.xlu0 %459 }
 0x121   :  { %v535_v51 = vsel %vm534_vm2, %v529_v49, %v531_v28  ;;  %v463_v52 = vsel %vm461_vm0, %v458_v20, %v460_v50  ;;  %v1294_v56 = vpop.permute.xlu2 %1293  ;;  %v147_v20 = vpop.f32.mrf.mxu0 }
 0x122   :  { %v2842_v61 = vsel %vm110_vm4, %v1294_v56, 0.0  ;;  %2405 = vmatpush.msk.msra.mxu3 %vm123_vm5, %v463_v52  ;;  %2407 = vmatpush.msk.msrb.mxu0 %vm123_vm5, %v535_v51 }
 0x123   :  { %1357 = vrot.lane.b32.xlu2 %v2842_v61, %s2580_s0  ;;  %2406 = vmatmul.msk.f32.vlgmr.msra.gmra.mxu3 %vm119_vm11, %v2814_v41  ;;  %v1409_v6 = vmul.f32 %v2663_v29, %v2842_v61 }
 0x124   :  { %2408 = vmatmul.msk.f32.vlgmr.msrb.gmra.mxu0 %vm119_vm11, %v2834_v57  ;;  %2412 = vmatmul.msk.f32.vlgmr.msrb.gmra.mxu2 %vm119_vm11, %v2839_v58 }
 0x125   :  { %2413 = vmatpush.msk.msrb.mxu3 %vm123_vm5, %v594_v62 }
 0x128   :  { %v533_v63 = vpop.permute.xlu0 %532  ;;  %v660_v0 = vpop.permute.xlu1 %659 }
 0x129   :  { %v536_v1 = vsel %vm534_vm2, %v531_v28, %v533_v63  ;;  %v666_v3 = vsel %vm665_vm3, %v660_v0, %v662_v43 }
 0x12a   :  { %2409 = vmatpush.msk.msrb.mxu1 %vm123_vm5, %v536_v1  ;;  %2415 = vmatpush.msk.msra.mxu0 %vm123_vm5, %v666_v3 }
 0x12b   :  { %1417 = vrot.lane.b32.xlu2 %v1409_v6, %s2583_s24  ;;  %2410 = vmatmul.msk.f32.vlgmr.msrb.gmra.mxu1 %vm119_vm11, %v2834_v57 }
 0x12c   :  { %2414 = vmatmul.msk.f32.vlgmr.msrb.gmra.mxu3 %vm119_vm11, %v2839_v58  ;;  %2416 = vmatmul.msk.f32.vlgmr.msra.gmra.mxu0 %vm119_vm11, %v2864_v5 }
 0x130   :  { %v664_v7 = vpop.permute.xlu0 %663  ;;  %v2875_v8 = vpop.permute.xlu1 %91 }
 0x131   :  { %v667_v9 = vsel %vm665_vm3, %v662_v43, %v664_v7  ;;  %v170_v23 = vadd.f32 %v147_v20, %v2875_v8  ;;  %v171_v43 = vadd.f32 %v167_v21, %v2875_v8 }
 0x132   :  { %2417 = vmatpush.msk.msra.mxu1 %vm123_vm5, %v667_v9 }
 0x133   :  { %2418 = vmatmul.msk.f32.vlgmr.msra.gmra.mxu1 %vm119_vm11, %v2864_v5 }
 0x138   :  { %v1292_v10 = vpop.permute.xlu1 %1291 }
 0x139   :  { %v2882_v11 = vsel %vm110_vm4, %v1292_v10, %v1294_v56  ;;  %v2885_v14 = vsel %vm110_vm4, 0.0, %v1292_v10 }
 0x13a   :  { %1353 = vrot.lane.b32.xlu0 %v2885_v14, %s2580_s0  ;;  %1355 = vrot.lane.b32.xlu1 %v2882_v11, %s2580_s0  ;;  %v1407_v15 = vmul.f32 %v2659_v26, %v2885_v14  ;;  %v1408_v18 = vmul.f32 %v2882_v11, %v2674_v32  ;;  %v1468_v19 = vmul.f32 %v2882_v11, %v2691_v39 }
 0x142   :  { %1413 = vrot.lane.b32.xlu0 %v1407_v15, %s2583_s24  ;;  %1415 = vrot.lane.b32.xlu1 %v1408_v18, %s2583_s24 }
 0x14a   :  { %1475 = vrot.lane.b32.xlu1 %v1468_v19, %s2585_s25 }
 0x176   :  { %v207_v24 = vpop.f32.mrf.mxu2 }
 0x177   :  { %v230_v28 = vadd.f32 %v207_v24, %v170_v23 }
 0x17d   :  { %v1358_v19 = vpop.permute.xlu2 %1357 }
 0x17e   :  { %v227_v35 = vpop.f32.mrf.mxu3 }
 0x17f   :  { %v231_v49 = vadd.f32 %v227_v35, %v171_v43  ;;  %v1467_v43 = vmul.f32 %v2670_v30, %v2885_v14 }
 0x188   :  { %v282_v25 = vpop.f32.mrf.mxu0 }
 0x189   :  { %v305_v31 = vadd.f32 %v282_v25, %v230_v28 }
 0x190   :  { %v302_v33 = vpop.f32.mrf.mxu1 }
 0x191   :  { %v415_v40 = vpop.f32.mrf.mxu0  ;;  %v306_v62 = vadd.f32 %v302_v33, %v231_v49 }
 0x196   :  { %v357_v36 = vpop.f32.mrf.mxu2 }
 0x197   :  { %v380_v42 = vadd.f32 %v357_v36, %v305_v31 }
 0x199   :  { %v438_v45 = vadd.f32 %v415_v40, %v380_v42  ;;  %v435_v46 = vpop.f32.mrf.mxu1  ;;  %v1469_v42 = vmul.f32 %v2682_v37, %v2842_v61 }
 0x19e   :  { %v377_v50 = vpop.f32.mrf.mxu3  ;;  %v488_v51 = vpop.f32.mrf.mxu2 }
 0x19f   :  { %v511_v52 = vadd.f32 %v488_v51, %v438_v45  ;;  %v381_v63 = vadd.f32 %v377_v50, %v306_v62  ;;  %v2916_v45 = vpop.permute.xlu2 %1417 }
 0x1a1   :  { %v561_v56 = vpop.f32.mrf.mxu0  ;;  %v439_v6 = vadd.f32 %v435_v46, %v381_v63 }
 0x1a2   :  { %v584_v0 = vadd.f32 %v561_v56, %v511_v52 }
 0x1a6   :  { %v508_v1 = vpop.f32.mrf.mxu3 }
 0x1a7   :  { %v619_v3 = vpop.f32.mrf.mxu2  ;;  %v512_v15 = vadd.f32 %v508_v1, %v439_v6 }
 0x1a8   :  { %v642_v7 = vadd.f32 %v619_v3, %v584_v0  ;;  %v581_v9 = vpop.f32.mrf.mxu1 }
 0x1a9   :  { %v692_v10 = vpop.f32.mrf.mxu0  ;;  %v585_v28 = vadd.f32 %v581_v9, %v512_v15 }
 0x1aa   :  { %v715_v18 = vadd.f32 %v692_v10, %v642_v7 }
 0x1ac   :  { %v717_v20 = vmax.f32 %v715_v18, 0.0  ;;  %v1354_v21 = vpop.permute.xlu0 %1353  ;;  %v1356_v23 = vpop.permute.xlu1 %1355 }
 0x1ad   :  { %v2903_v24 = vsel %vm180_vm12, %v1354_v21, %v1356_v23  ;;  %v2906_v25 = vsel %vm180_vm12, %v1356_v23, %v1358_v19 }
 0x1ae   :  { %721 = vrot.lane.b32.xlu2 %v717_v20, %s2574_s14 }
 0x1af   :  { %v639_v31 = vpop.f32.mrf.mxu3 }
 0x1b0   :  { %v643_v33 = vadd.f32 %v639_v31, %v585_v28  ;;  %v712_v35 = vpop.f32.mrf.mxu1 }
 0x1b2   :  { %v716_v36 = vadd.f32 %v712_v35, %v643_v33  ;;  %v1581_v33 = vmul.f32 %v2687_v38, %v2885_v14 }
 0x1b4   :  { %v718_v40 = vmax.f32 %v716_v36, 0.0  ;;  %v2918_v46 = vpop.permute.xlu1 %1415  ;;  %v2929_v63 = vpop.permute.xlu0 %1413 }
 0x1b6   :  { %1477 = vrot.lane.b32.xlu2 %v1469_v42, %s2585_s25  ;;  %723 = vrot.lane.b32.xlu0 %v718_v40, %s2574_s14  ;;  %v1641_v40 = vmul.f32 %v2704_v47, %v2885_v14 }
 0x1bc   :  { %v1476_v52 = vpop.permute.xlu1 %1475 }
 0x1be   :  { %1473 = vrot.lane.b32.xlu0 %v1467_v43, %s2585_s25 }
 0x208   :  { %v722_v49 = vpop.permute.xlu2 %721 }
 0x209   :  { %v729_v50 = vsel %vm110_vm4, 0.0, %v722_v49 }
 0x20a   :  { %786 = vrot.lane.b32.xlu0 %v729_v50, %s2580_s0  ;;  %v731_v51 = vmul.f32 %v2613_v12, %v729_v50  ;;  %v843_v0 = vmul.f32 %v2659_v26, %v729_v50  ;;  %v906_v3 = vmul.f32 %v2670_v30, %v729_v50  ;;  %v1026_v15 = vmul.f32 %v2687_v38, %v729_v50 }
 0x20b   :  { %v1089_v19 = vmul.f32 %v2704_v47, %v729_v50  ;;  %v1209_v20 = vmul.f32 %v2722_v54, %v729_v50 }
 0x20c   :  { %2419 = vmatpush.msk.msra.mxu2 %vm123_vm5, %v731_v51  ;;  %v1755_v51 = vmul.f32 %v2722_v54, %v2885_v14 }
 0x210   :  { %v1478_v56 = vpop.permute.xlu2 %1477 }
 0x211   :  { %v2925_v62 = vsel %vm330_vm15, %v1476_v52, %v1478_v56  ;;  %v1582_v56 = vmul.f32 %v2882_v11, %v2709_v48 }
 0x212   :  { %969 = vrot.lane.b32.xlu0 %v729_v50, %s2581_s22 }
 0x21a   :  { %1152 = vrot.lane.b32.xlu0 %v729_v50, %s2582_s23 }
 0x222   :  { %849 = vrot.lane.b32.xlu0 %v843_v0, %s2583_s24  ;;  %v1643_v0 = vmul.f32 %v2717_v53, %v2842_v61 }
 0x228   :  { %v724_v1 = vpop.permute.xlu0 %723 }
 0x229   :  { %v725_v6 = vsel %vm110_vm4, %v722_v49, %v724_v1  ;;  %v730_v7 = vsel %vm110_vm4, %v724_v1, 0.0  ;;  %v1642_v1 = vmul.f32 %v2882_v11, %v2726_v55 }
 0x22a   :  { %912 = vrot.lane.b32.xlu0 %v906_v3, %s2585_s25  ;;  %790 = vrot.lane.b32.xlu2 %v730_v7, %s2580_s0  ;;  %v732_v9 = vmul.f32 %v2615_v13, %v725_v6  ;;  %v845_v21 = vmul.f32 %v2663_v29, %v730_v7  ;;  %v844_v23 = vmul.f32 %v725_v6, %v2674_v32 }
 0x22b   :  { %788 = vrot.lane.b32.xlu1 %v725_v6, %s2580_s0  ;;  %v908_v28 = vmul.f32 %v2682_v37, %v730_v7  ;;  %v907_v31 = vmul.f32 %v725_v6, %v2691_v39  ;;  %v1028_v35 = vmul.f32 %v2699_v44, %v730_v7  ;;  %v1027_v36 = vmul.f32 %v725_v6, %v2709_v48 }
 0x22c   :  { %2421 = vmatpush.msk.msra.mxu3 %vm123_vm5, %v732_v9  ;;  %v1091_v42 = vmul.f32 %v2717_v53, %v730_v7  ;;  %v1090_v43 = vmul.f32 %v725_v6, %v2726_v55  ;;  %v1211_v49 = vmul.f32 %v2734_v59, %v730_v7  ;;  %v1210_v50 = vmul.f32 %v725_v6, %v2741_v60 }
 0x22d   :  { %v1756_v9 = vmul.f32 %v2882_v11, %v2741_v60 }
 0x230   :  { %v1474_v10 = vpop.permute.xlu0 %1473 }
 0x231   :  { %v2943_v18 = vsel %vm330_vm15, %v1474_v10, %v1476_v52  ;;  %v1583_v52 = vmul.f32 %v2699_v44, %v2842_v61 }
 0x232   :  { %1032 = vrot.lane.b32.xlu0 %v1026_v15, %s2586_s26  ;;  %973 = vrot.lane.b32.xlu2 %v730_v7, %s2581_s22 }
 0x233   :  { %971 = vrot.lane.b32.xlu1 %v725_v6, %s2581_s22 }
 0x23a   :  { %1095 = vrot.lane.b32.xlu0 %v1089_v19, %s2587_s27  ;;  %1156 = vrot.lane.b32.xlu2 %v730_v7, %s2582_s23  ;;  %v1757_v7 = vmul.f32 %v2734_v59, %v2842_v61  ;;  %v3016_v19 = vld [vmem:[%s3391_s1 + $0x24] sm:$0xf] }
 0x23b   :  { %1154 = vrot.lane.b32.xlu1 %v725_v6, %s2582_s23  ;;  %2420 = vmatmul.msk.f32.vlgmr.msra.gmra.mxu2 %vm119_vm11, %v3016_v19 }
 0x23c   :  { %2422 = vmatmul.msk.f32.vlgmr.msra.gmra.mxu3 %vm119_vm11, %v3016_v19 }
 0x242   :  { %1215 = vrot.lane.b32.xlu0 %v1209_v20, %s2588_s28  ;;  %853 = vrot.lane.b32.xlu2 %v845_v21, %s2583_s24 }
 0x243   :  { %851 = vrot.lane.b32.xlu1 %v844_v23, %s2583_s24  ;;  %v3025_v23 = vld [vmem:[%s3391_s1 + $0x28] sm:$0xf] }
 0x24a   :  { %1527 = vrot.lane.b32.xlu0 %v2885_v14, %s2581_s22  ;;  %916 = vrot.lane.b32.xlu2 %v908_v28, %s2585_s25 }
 0x24b   :  { %914 = vrot.lane.b32.xlu1 %v907_v31, %s2585_s25 }
 0x252   :  { %1587 = vrot.lane.b32.xlu0 %v1581_v33, %s2586_s26  ;;  %1036 = vrot.lane.b32.xlu2 %v1028_v35, %s2586_s26 }
 0x253   :  { %1034 = vrot.lane.b32.xlu1 %v1027_v36, %s2586_s26 }
 0x25a   :  { %1647 = vrot.lane.b32.xlu0 %v1641_v40, %s2587_s27  ;;  %1099 = vrot.lane.b32.xlu2 %v1091_v42, %s2587_s27 }
 0x25b   :  { %1097 = vrot.lane.b32.xlu1 %v1090_v43, %s2587_s27 }
 0x262   :  { %1701 = vrot.lane.b32.xlu0 %v2885_v14, %s2582_s23  ;;  %1219 = vrot.lane.b32.xlu2 %v1211_v49, %s2588_s28 }
 0x263   :  { %1217 = vrot.lane.b32.xlu1 %v1210_v50, %s2588_s28 }
 0x26a   :  { %1761 = vrot.lane.b32.xlu0 %v1755_v51, %s2588_s28  ;;  %1531 = vrot.lane.b32.xlu2 %v2842_v61, %s2581_s22 }
 0x26b   :  { %1529 = vrot.lane.b32.xlu1 %v2882_v11, %s2581_s22 }
 0x272   :  { %1591 = vrot.lane.b32.xlu2 %v1583_v52, %s2586_s26 }
 0x273   :  { %1589 = vrot.lane.b32.xlu1 %v1582_v56, %s2586_s26  ;;  %v3040_v56 = vld [vmem:[%s3391_s1 + $0x2c] sm:$0xf] }
 0x27a   :  { %1651 = vrot.lane.b32.xlu2 %v1643_v0, %s2587_s27 }
 0x27b   :  { %1649 = vrot.lane.b32.xlu1 %v1642_v1, %s2587_s27 }
 0x27c   :  { %v787_v3 = vpop.permute.xlu0 %786 }
 0x282   :  { %1705 = vrot.lane.b32.xlu2 %v2842_v61, %s2582_s23 }
 0x283   :  { %1703 = vrot.lane.b32.xlu1 %v2882_v11, %s2582_s23 }
 0x284   :  { %v791_v6 = vpop.permute.xlu2 %790  ;;  %v970_v10 = vpop.permute.xlu0 %969 }
 0x28a   :  { %1765 = vrot.lane.b32.xlu2 %v1757_v7, %s2588_s28  ;;  %v3055_v7 = vld [vmem:[%s3391_s1 + $0x30] sm:$0xf] }
 0x28b   :  { %1763 = vrot.lane.b32.xlu1 %v1756_v9, %s2588_s28 }
 0x28c   :  { %v974_v15 = vpop.permute.xlu2 %973  ;;  %v1153_v20 = vpop.permute.xlu0 %1152 }
 0x294   :  { %v1157_v61 = vpop.permute.xlu2 %1156  ;;  %v850_v33 = vpop.permute.xlu0 %849 }
 0x29c   :  { %v854_v35 = vpop.permute.xlu2 %853  ;;  %v913_v40 = vpop.permute.xlu0 %912 }
 0x29d   :  { %v789_v21 = vpop.permute.xlu1 %788 }
 0x29e   :  { %v792_v28 = vsel %vm180_vm12, %v787_v3, %v789_v21  ;;  %v793_v31 = vsel %vm180_vm12, %v789_v21, %v791_v6 }
 0x29f   :  { %2423 = vmatpush.msk.msrb.mxu0 %vm123_vm5, %v792_v28  ;;  %2425 = vmatpush.msk.msrb.mxu1 %vm123_vm5, %v793_v31 }
 0x2a0   :  { %2424 = vmatmul.msk.f32.vlgmr.msrb.gmra.mxu0 %vm119_vm11, %v3025_v23  ;;  %2426 = vmatmul.msk.f32.vlgmr.msrb.gmra.mxu1 %vm119_vm11, %v3025_v23 }
 0x2a4   :  { %v917_v42 = vpop.permute.xlu2 %916  ;;  %v1033_v50 = vpop.permute.xlu0 %1032 }
 0x2a5   :  { %v972_v36 = vpop.permute.xlu1 %971 }
 0x2a6   :  { %v975_v0 = vsel %vm388_vm14, %v970_v10, %v972_v36  ;;  %v976_v1 = vsel %vm388_vm14, %v972_v36, %v974_v15  ;;  %v3062_v15 = vld [vmem:[%s3391_s1 + $0x34] sm:$0xf] }
 0x2ac   :  { %v1037_v3 = vpop.permute.xlu2 %1036  ;;  %v1096_v21 = vpop.permute.xlu0 %1095 }
 0x2ad   :  { %v1155_v43 = vpop.permute.xlu1 %1154 }
 0x2b4   :  { %v1100_v28 = vpop.permute.xlu2 %1099 }
 0x2b5   :  { %v852_v49 = vpop.permute.xlu1 %851 }
 0x2b6   :  { %v855_v51 = vsel %vm255_vm13, %v850_v33, %v852_v49  ;;  %v856_v52 = vsel %vm255_vm13, %v852_v49, %v854_v35  ;;  %v3077_v33 = vld [vmem:[%s3391_s1 + $0x38] sm:$0xf]  ;;  %v1159_v49 = vsel %vm592_vm1, %v1155_v43, %v1157_v61  ;;  %v3100_v61 = vld [vmem:[%s3391_s1 + $0x3c] sm:$0xf] }
 0x2b7   :  { %2427 = vmatpush.msk.msrb.mxu2 %vm123_vm5, %v855_v51  ;;  %2429 = vmatpush.msk.msrb.mxu3 %vm123_vm5, %v856_v52  ;;  %v1216_v51 = vpop.permute.xlu0 %1215  ;;  %v3107_v52 = vld [vmem:[%s3391_s1 + $0x40] sm:$0xf] }
 0x2b8   :  { %2428 = vmatmul.msk.f32.vlgmr.msrb.gmra.mxu2 %vm119_vm11, %v3040_v56  ;;  %2430 = vmatmul.msk.f32.vlgmr.msrb.gmra.mxu3 %vm119_vm11, %v3040_v56  ;;  %3397 = vst [vmem:[#allocation4_spill] sm:$0xff] %v3107_v52 }
 0x2b9   :  { %2435 = vmatpush.msk.msra.mxu2 %vm123_vm5, %v975_v0  ;;  %2437 = vmatpush.msk.msra.mxu3 %vm123_vm5, %v976_v1  ;;  %v1419_v0 = vsel %vm255_vm13, %v2929_v63, %v2918_v46  ;;  %v1420_v1 = vsel %vm255_vm13, %v2918_v46, %v2916_v45  ;;  %v3130_v63 = vld [vmem:[%s3391_s1 + $0x44] sm:$0xf] }
 0x2bd   :  { %v915_v6 = vpop.permute.xlu1 %914 }
 0x2be   :  { %v918_v9 = vsel %vm330_vm15, %v913_v40, %v915_v6  ;;  %v919_v10 = vsel %vm330_vm15, %v915_v6, %v917_v42  ;;  %v1301_v40 = vmul.f32 %v2613_v12, %v2885_v14  ;;  %v1158_v42 = vsel %vm592_vm1, %v1153_v20, %v1155_v43  ;;  %v1220_v14 = vpop.permute.xlu2 %1219 }
 0x2bf   :  { %2431 = vmatpush.msk.msra.mxu0 %vm123_vm5, %v918_v9  ;;  %2433 = vmatpush.msk.msra.mxu1 %vm123_vm5, %v919_v10 }
 0x2c0   :  { %2432 = vmatmul.msk.f32.vlgmr.msra.gmra.mxu0 %vm119_vm11, %v3055_v7  ;;  %2434 = vmatmul.msk.f32.vlgmr.msra.gmra.mxu1 %vm119_vm11, %v3055_v7 }
 0x2c1   :  { %2436 = vmatmul.msk.f32.vlgmr.msra.gmra.mxu2 %vm119_vm11, %v3062_v15  ;;  %2438 = vmatmul.msk.f32.vlgmr.msra.gmra.mxu3 %vm119_vm11, %v3062_v15 }
 0x2c5   :  { %v1035_v31 = vpop.permute.xlu1 %1034 }
 0x2c6   :  { %v1038_v35 = vsel %vm461_vm0, %v1033_v50, %v1035_v31  ;;  %v1039_v36 = vsel %vm461_vm0, %v1035_v31, %v1037_v3  ;;  %v1302_v50 = vmul.f32 %v2615_v13, %v2882_v11  ;;  %v1528_v3 = vpop.permute.xlu0 %1527  ;;  %v1532_v6 = vpop.permute.xlu2 %1531 }
 0x2c7   :  { %2439 = vmatpush.msk.msrb.mxu0 %vm123_vm5, %v1038_v35  ;;  %2441 = vmatpush.msk.msrb.mxu1 %vm123_vm5, %v1039_v36 }
 0x2c8   :  { %2440 = vmatmul.msk.f32.vlgmr.msrb.gmra.mxu0 %vm119_vm11, %v3077_v33  ;;  %2442 = vmatmul.msk.f32.vlgmr.msrb.gmra.mxu1 %vm119_vm11, %v3077_v33 }
 0x2c9   :  { %2447 = vmatpush.msk.msra.mxu0 %vm123_vm5, %v1158_v42  ;;  %2449 = vmatpush.msk.msra.mxu1 %vm123_vm5, %v1159_v49 }
 0x2cb   :  { %2456 = vmatpush.msk.msrb.mxu0 %vm123_vm5, %v1301_v40  ;;  %2458 = vmatpush.msk.msrb.mxu1 %vm123_vm5, %v1302_v50 }
 0x2cd   :  { %v1098_v20 = vpop.permute.xlu1 %1097 }
 0x2ce   :  { %v1101_v43 = vsel %vm534_vm2, %v1096_v21, %v1098_v20  ;;  %v1102_v11 = vsel %vm534_vm2, %v1098_v20, %v1100_v28  ;;  %v1588_v21 = vpop.permute.xlu0 %1587  ;;  %v1592_v35 = vpop.permute.xlu2 %1591 }
 0x2cf   :  { %2443 = vmatpush.msk.msrb.mxu2 %vm123_vm5, %v1101_v43  ;;  %2445 = vmatpush.msk.msrb.mxu3 %vm123_vm5, %v1102_v11  ;;  %v3208_v43 = vpop.f32.mrf.mxu2  ;;  %v3210_v11 = vpop.f32.mrf.mxu3 }
 0x2d0   :  { %2444 = vmatmul.msk.f32.vlgmr.msrb.gmra.mxu2 %vm119_vm11, %v3100_v61  ;;  %2446 = vmatmul.msk.f32.vlgmr.msrb.gmra.mxu3 %vm119_vm11, %v3100_v61 }
 0x2d1   :  { %2448 = vmatmul.msk.f32.vlgmr.msra.gmra.mxu0 %vm119_vm11, %v3107_v52  ;;  %2450 = vmatmul.msk.f32.vlgmr.msra.gmra.mxu1 %vm119_vm11, %v3107_v52 }
 0x2d2   :  { %2464 = vmatpush.msk.msra.mxu0 %vm123_vm5, %v1419_v0  ;;  %2466 = vmatpush.msk.msra.mxu1 %vm123_vm5, %v1420_v1 }
 0x2d5   :  { %v1218_v9 = vpop.permute.xlu1 %1217 }
 0x2d6   :  { %v1221_v45 = vsel %vm665_vm3, %v1216_v51, %v1218_v9  ;;  %v1222_v46 = vsel %vm665_vm3, %v1218_v9, %v1220_v14 }
 0x2d7   :  { %2451 = vmatpush.msk.msra.mxu2 %vm123_vm5, %v1221_v45  ;;  %2453 = vmatpush.msk.msra.mxu3 %vm123_vm5, %v1222_v46 }
 0x2d8   :  { %2452 = vmatmul.msk.f32.vlgmr.msra.gmra.mxu2 %vm119_vm11, %v3130_v63  ;;  %2454 = vmatmul.msk.f32.vlgmr.msra.gmra.mxu3 %vm119_vm11, %v3130_v63 }
 0x2d9   :  { %2457 = vmatmul.msk.f32.vlgmr.msrb.gmra.mxu0 %vm119_vm11, %v2757_v2  ;;  %2459 = vmatmul.msk.f32.vlgmr.msrb.gmra.mxu1 %vm119_vm11, %v2757_v2 }
 0x2da   :  { %2460 = vmatpush.msk.msrb.mxu2 %vm123_vm5, %v2903_v24  ;;  %2462 = vmatpush.msk.msrb.mxu3 %vm123_vm5, %v2906_v25 }
 0x2dc   :  { %2468 = vmatpush.msk.msra.mxu2 %vm123_vm5, %v2943_v18  ;;  %2470 = vmatpush.msk.msra.mxu3 %vm123_vm5, %v2925_v62  ;;  %v1648_v62 = vpop.permute.xlu0 %1647 }
 0x2dd   :  { %v1530_v10 = vpop.permute.xlu1 %1529 }
 0x2de   :  { %v1533_v28 = vsel %vm388_vm14, %v1528_v3, %v1530_v10  ;;  %v1534_v31 = vsel %vm388_vm14, %v1530_v10, %v1532_v6 }
 0x2df   :  { %2472 = vmatpush.msk.msrb.mxu0 %vm123_vm5, %v1533_v28  ;;  %2474 = vmatpush.msk.msrb.mxu1 %vm123_vm5, %v1534_v31 }
 0x2e0   :  { %2461 = vmatmul.msk.f32.vlgmr.msrb.gmra.mxu2 %vm119_vm11, %v2766_v4  ;;  %2463 = vmatmul.msk.f32.vlgmr.msrb.gmra.mxu3 %vm119_vm11, %v2766_v4  ;;  %v1652_v4 = vpop.permute.xlu2 %1651 }
 0x2e1   :  { %2465 = vmatmul.msk.f32.vlgmr.msra.gmra.mxu0 %vm119_vm11, %v2782_v22  ;;  %2467 = vmatmul.msk.f32.vlgmr.msra.gmra.mxu1 %vm119_vm11, %v2782_v22 }
 0x2e5   :  { %v1590_v2 = vpop.permute.xlu1 %1589 }
 0x2e6   :  { %v1593_v24 = vsel %vm461_vm0, %v1588_v21, %v1590_v2  ;;  %v1594_v25 = vsel %vm461_vm0, %v1590_v2, %v1592_v35 }
 0x2e7   :  { %2476 = vmatpush.msk.msrb.mxu2 %vm123_vm5, %v1593_v24  ;;  %2478 = vmatpush.msk.msrb.mxu3 %vm123_vm5, %v1594_v25 }
 0x2e8   :  { %2469 = vmatmul.msk.f32.vlgmr.msra.gmra.mxu2 %vm119_vm11, %v2792_v27  ;;  %2471 = vmatmul.msk.f32.vlgmr.msra.gmra.mxu3 %vm119_vm11, %v2792_v27  ;;  %v1702_v27 = vpop.permute.xlu0 %1701 }
 0x2e9   :  { %2473 = vmatmul.msk.f32.vlgmr.msrb.gmra.mxu0 %vm119_vm11, %v2799_v34  ;;  %2475 = vmatmul.msk.f32.vlgmr.msrb.gmra.mxu1 %vm119_vm11, %v2799_v34  ;;  %v1706_v34 = vpop.permute.xlu2 %1705 }
 0x2ed   :  { %v1650_v22 = vpop.permute.xlu1 %1649 }
 0x2ee   :  { %v1653_v18 = vsel %vm534_vm2, %v1648_v62, %v1650_v22  ;;  %v1654_v36 = vsel %vm534_vm2, %v1650_v22, %v1652_v4 }
 0x2ef   :  { %2480 = vmatpush.msk.msra.mxu0 %vm123_vm5, %v1653_v18  ;;  %2482 = vmatpush.msk.msra.mxu1 %vm123_vm5, %v1654_v36 }
 0x2f0   :  { %2477 = vmatmul.msk.f32.vlgmr.msrb.gmra.mxu2 %vm119_vm11, %v2814_v41  ;;  %2479 = vmatmul.msk.f32.vlgmr.msrb.gmra.mxu3 %vm119_vm11, %v2814_v41  ;;  %v1762_v41 = vpop.permute.xlu0 %1761 }
 0x2f1   :  { %2481 = vmatmul.msk.f32.vlgmr.msra.gmra.mxu0 %vm119_vm11, %v2834_v57  ;;  %2483 = vmatmul.msk.f32.vlgmr.msra.gmra.mxu1 %vm119_vm11, %v2834_v57  ;;  %v1766_v50 = vpop.permute.xlu2 %1765 }
 0x2f5   :  { %v1704_v40 = vpop.permute.xlu1 %1703 }
 0x2f6   :  { %v1707_v42 = vsel %vm592_vm1, %v1702_v27, %v1704_v40  ;;  %v1708_v49 = vsel %vm592_vm1, %v1704_v40, %v1706_v34 }
 0x2f7   :  { %2484 = vmatpush.msk.msra.mxu2 %vm123_vm5, %v1707_v42  ;;  %2486 = vmatpush.msk.msra.mxu3 %vm123_vm5, %v1708_v49 }
 0x2f8   :  { %2485 = vmatmul.msk.f32.vlgmr.msra.gmra.mxu2 %vm119_vm11, %v2839_v58  ;;  %2487 = vmatmul.msk.f32.vlgmr.msra.gmra.mxu3 %vm119_vm11, %v2839_v58 }
 0x2fd   :  { %v1764_v57 = vpop.permute.xlu1 %1763 }
 0x2fe   :  { %v1767_v51 = vsel %vm665_vm3, %v1762_v41, %v1764_v57  ;;  %v1768_v14 = vsel %vm665_vm3, %v1764_v57, %v1766_v50 }
 0x2ff   :  { %2488 = vmatpush.msk.msrb.mxu0 %vm123_vm5, %v1767_v51  ;;  %2490 = vmatpush.msk.msrb.mxu1 %vm123_vm5, %v1768_v14 }
 0x300   :  { %2489 = vmatmul.msk.f32.vlgmr.msrb.gmra.mxu0 %vm119_vm11, %v2864_v5  ;;  %2491 = vmatmul.msk.f32.vlgmr.msrb.gmra.mxu1 %vm119_vm11, %v2864_v5 }
 0x31d   :  { %v3204_v20 = vpop.f32.mrf.mxu0  ;;  %v3206_v58 = vpop.f32.mrf.mxu1 }
 0x33b   :  { %v3216_v3 = vpop.f32.mrf.mxu2  ;;  %v3218_v6 = vpop.f32.mrf.mxu3 }
 0x33d   :  { %v3212_v0 = vpop.f32.mrf.mxu0  ;;  %v3214_v1 = vpop.f32.mrf.mxu1 }
 0x344   :  { %v3224_v5 = vpop.f32.mrf.mxu2  ;;  %v3226_v46 = vpop.f32.mrf.mxu3 }
 0x345   :  { %v3220_v9 = vpop.f32.mrf.mxu0  ;;  %v3222_v45 = vpop.f32.mrf.mxu1 }
 0x346   :  { %3398 = vst [vmem:[#allocation5_spill] sm:$0xff] %v3222_v45 }
 0x34e   :  { %v3228_v10 = vpop.f32.mrf.mxu0  ;;  %v3230_v21 = vpop.f32.mrf.mxu1 }
 0x34f   :  { %3399 = vst [vmem:[#allocation6_spill] sm:$0xff] %v3228_v10 }
 0x350   :  { %3400 = vst [vmem:[#allocation7_spill] sm:$0xff] %v3230_v21 }
 0x353   :  { %v3232_v28 = vpop.f32.mrf.mxu2  ;;  %v3234_v31 = vpop.f32.mrf.mxu3 }
 0x354   :  { %3401 = vst [vmem:[#allocation8_spill] sm:$0xff] %v3232_v28 }
 0x355   :  { %3402 = vst [vmem:[#allocation9_spill] sm:$0xff] %v3234_v31 }
 0x356   :  { %v1326_v35 = vpop.f32.mrf.mxu0  ;;  %v1346_v2 = vpop.f32.mrf.mxu1 }
 0x357   :  { %v1349_v36 = vadd.f32 %v1326_v35, %v2875_v8  ;;  %v1350_v27 = vadd.f32 %v1346_v2, %v2875_v8 }
 0x35b   :  { %v3236_v24 = vpop.f32.mrf.mxu2  ;;  %v3238_v25 = vpop.f32.mrf.mxu3 }
 0x35c   :  { %3403 = vst [vmem:[#allocation10_spill] sm:$0xff] %v3236_v24 }
 0x35d   :  { %3404 = vst [vmem:[#allocation11_spill] sm:$0xff] %v3238_v25 }
 0x35e   :  { %v1442_v62 = vpop.f32.mrf.mxu0  ;;  %v1462_v4 = vpop.f32.mrf.mxu1 }
 0x363   :  { %v1382_v22 = vpop.f32.mrf.mxu2  ;;  %v1402_v18 = vpop.f32.mrf.mxu3 }
 0x364   :  { %v1405_v42 = vadd.f32 %v1382_v22, %v1349_v36  ;;  %v1406_v49 = vadd.f32 %v1402_v18, %v1350_v27 }
 0x366   :  { %v1556_v34 = vpop.f32.mrf.mxu0  ;;  %v1576_v40 = vpop.f32.mrf.mxu1  ;;  %v1465_v57 = vadd.f32 %v1442_v62, %v1405_v42  ;;  %v1466_v51 = vadd.f32 %v1462_v4, %v1406_v49 }
 0x36b   :  { %v1502_v41 = vpop.f32.mrf.mxu2  ;;  %v1522_v50 = vpop.f32.mrf.mxu3 }
 0x36c   :  { %v1525_v14 = vadd.f32 %v1502_v41, %v1465_v57  ;;  %v1526_v16 = vadd.f32 %v1522_v50, %v1466_v51 }
 0x36e   :  { %v1676_v17 = vpop.f32.mrf.mxu0  ;;  %v1696_v52 = vpop.f32.mrf.mxu1  ;;  %v1579_v21 = vadd.f32 %v1556_v34, %v1525_v14  ;;  %v1580_v10 = vadd.f32 %v1576_v40, %v1526_v16 }
 0x373   :  { %v1616_v25 = vpop.f32.mrf.mxu2  ;;  %v1636_v24 = vpop.f32.mrf.mxu3 }
 0x374   :  { %v1639_v31 = vadd.f32 %v1616_v25, %v1579_v21  ;;  %v1640_v35 = vadd.f32 %v1636_v24, %v1580_v10 }
 0x376   :  { %v1699_v28 = vadd.f32 %v1676_v17, %v1639_v31  ;;  %v1700_v8 = vadd.f32 %v1696_v52, %v1640_v35 }
 0x37b   :  { %v1730_v2 = vpop.f32.mrf.mxu2  ;;  %v1750_v45 = vpop.f32.mrf.mxu3 }
 0x37c   :  { %v1753_v22 = vadd.f32 %v1730_v2, %v1699_v28  ;;  %v1754_v18 = vadd.f32 %v1750_v45, %v1700_v8 }
 0x37d   :  { %v1790_v36 = vpop.f32.mrf.mxu0  ;;  %v1810_v27 = vpop.f32.mrf.mxu1 }
 0x37e   :  { %v1813_v62 = vadd.f32 %v1790_v36, %v1753_v22  ;;  %v1814_v4 = vadd.f32 %v1810_v27, %v1754_v18 }
 0x380   :  { %v1815_v42 = vmax.f32 %v1813_v62, 0.0  ;;  %v1816_v49 = vmax.f32 %v1814_v4, 0.0 }
 0x382   :  { %1819 = vrot.lane.b32.xlu0 %v1815_v42, %s2574_s14  ;;  %1821 = vrot.lane.b32.xlu1 %v1816_v49, %s2574_s14 }
 0x3f4   :  { %v1820_v34 = vpop.permute.xlu0 %1819  ;;  %v1822_v16 = vpop.permute.xlu1 %1821 }
 0x3f5   :  { %v1827_v10 = vsel %vm110_vm4, 0.0, %v1820_v34  ;;  %v1823_v17 = vsel %vm110_vm4, %v1820_v34, %v1822_v16  ;;  %v1828_v52 = vsel %vm110_vm4, %v1822_v16, 0.0 }
 0x3f6   :  { %1881 = vrot.lane.b32.xlu1 %v1827_v10, %s2580_s0  ;;  %1885 = vrot.lane.b32.xlu0 %v1828_v52, %s2580_s0  ;;  %v1829_v45 = vmul.f32 %v2613_v12, %v1827_v10  ;;  %v1830_v21 = vmul.f32 %v2615_v13, %v1823_v17  ;;  %v1935_v12 = vmul.f32 %v2659_v26, %v1827_v10 }
 0x3f7   :  { %1883 = vrot.lane.b32.xlu2 %v1823_v17, %s2580_s0  ;;  %v1937_v13 = vmul.f32 %v2663_v29, %v1828_v52  ;;  %v1936_v28 = vmul.f32 %v1823_v17, %v2674_v32  ;;  %v1997_v31 = vmul.f32 %v2682_v37, %v1828_v52  ;;  %v1996_v24 = vmul.f32 %v1823_v17, %v2691_v39 }
 0x3f8   :  { %2492 = vmatpush.msk.msrb.mxu2 %vm123_vm5, %v1829_v45  ;;  %2494 = vmatpush.msk.msrb.mxu3 %vm123_vm5, %v1830_v21  ;;  %v2169_v26 = vmul.f32 %v2704_v47, %v1827_v10  ;;  %v2171_v29 = vmul.f32 %v2717_v53, %v1828_v52  ;;  %v2170_v32 = vmul.f32 %v1823_v17, %v2726_v55 }
 0x3f9   :  { %2495 = vmatmul.msk.f32.vlgmr.msrb.gmra.mxu3 %vm119_vm11, %v3016_v19  ;;  %2493 = vmatmul.msk.f32.vlgmr.msrb.gmra.mxu2 %vm119_vm11, %v3016_v19  ;;  %v1995_v19 = vmul.f32 %v2670_v30, %v1827_v10  ;;  %v2109_v30 = vmul.f32 %v2687_v38, %v1827_v10  ;;  %v2111_v37 = vmul.f32 %v2699_v44, %v1828_v52  ;;  %v2382_v38 = vld [vmem:[%s3390_s2 + $0x4] sm:$0xf] }
 0x3fa   :  { %v2110_v39 = vmul.f32 %v1823_v17, %v2709_v48  ;;  %v2283_v47 = vmul.f32 %v2722_v54, %v1827_v10  ;;  %v2285_v53 = vmul.f32 %v2734_v59, %v1828_v52  ;;  %v2284_v55 = vmul.f32 %v1823_v17, %v2741_v60 }
 0x3fe   :  { %2055 = vrot.lane.b32.xlu1 %v1827_v10, %s2581_s22  ;;  %2059 = vrot.lane.b32.xlu0 %v1828_v52, %s2581_s22 }
 0x3ff   :  { %2057 = vrot.lane.b32.xlu2 %v1823_v17, %s2581_s22 }
 0x406   :  { %1941 = vrot.lane.b32.xlu1 %v1935_v12, %s2583_s24  ;;  %1945 = vrot.lane.b32.xlu0 %v1937_v13, %s2583_s24 }
 0x407   :  { %1943 = vrot.lane.b32.xlu2 %v1936_v28, %s2583_s24 }
 0x40e   :  { %2001 = vrot.lane.b32.xlu1 %v1995_v19, %s2585_s25  ;;  %2005 = vrot.lane.b32.xlu0 %v1997_v31, %s2585_s25 }
 0x40f   :  { %2003 = vrot.lane.b32.xlu2 %v1996_v24, %s2585_s25 }
 0x416   :  { %2175 = vrot.lane.b32.xlu1 %v2169_v26, %s2587_s27  ;;  %2179 = vrot.lane.b32.xlu0 %v2171_v29, %s2587_s27 }
 0x417   :  { %2177 = vrot.lane.b32.xlu2 %v2170_v32, %s2587_s27  ;;  %v3407_v32 = vld [vmem:[#allocation9_spill] sm:$0xff] }
 0x41e   :  { %2115 = vrot.lane.b32.xlu1 %v2109_v30, %s2586_s26  ;;  %2119 = vrot.lane.b32.xlu0 %v2111_v37, %s2586_s26  ;;  %v3408_v30 = vld [vmem:[#allocation6_spill] sm:$0xff]  ;;  %v3409_v37 = vld [vmem:[#allocation7_spill] sm:$0xff] }
 0x41f   :  { %2117 = vrot.lane.b32.xlu2 %v2110_v39, %s2586_s26 }
 0x426   :  { %2289 = vrot.lane.b32.xlu1 %v2283_v47, %s2588_s28  ;;  %2293 = vrot.lane.b32.xlu0 %v2285_v53, %s2588_s28 }
 0x427   :  { %2291 = vrot.lane.b32.xlu2 %v2284_v55, %s2588_s28 }
 0x42e   :  { %2229 = vrot.lane.b32.xlu1 %v1827_v10, %s2582_s23  ;;  %2233 = vrot.lane.b32.xlu0 %v1828_v52, %s2582_s23 }
 0x42f   :  { %2231 = vrot.lane.b32.xlu2 %v1823_v17, %s2582_s23 }
 0x437   :  { %98 = vperm.xlu2 %2571, %v2382_v38  }
 0x451   :  { %v1884_v44 = vpop.permute.xlu2 %1883 }
 0x459   :  { %v2058_v48 = vpop.permute.xlu2 %2057 }
 0x461   :  { %v1944_v54 = vpop.permute.xlu2 %1943 }
 0x468   :  { %v1886_v59 = vpop.permute.xlu0 %1885  ;;  %v1882_v60 = vpop.permute.xlu1 %1881 }
 0x469   :  { %v1888_v25 = vsel %vm180_vm12, %v1884_v44, %v1886_v59  ;;  %v2004_v40 = vpop.permute.xlu2 %2003  ;;  %v1887_v41 = vsel %vm180_vm12, %v1882_v60, %v1884_v44  ;;  %v3411_v44 = vld [vmem:[#allocation11_spill] sm:$0xff] }
 0x46a   :  { %2496 = vmatpush.msk.msra.mxu0 %vm123_vm5, %v1887_v41  ;;  %2498 = vmatpush.msk.msra.mxu1 %vm123_vm5, %v1888_v25  ;;  %v3413_v59 = vld [vmem:[#allocation3_spill] sm:$0xff]  ;;  %v3414_v25 = vld [vmem:[#allocation2_spill] sm:$0xff] }
 0x46b   :  { %2499 = vmatmul.msk.f32.vlgmr.msra.gmra.mxu1 %vm119_vm11, %v3025_v23  ;;  %2497 = vmatmul.msk.f32.vlgmr.msra.gmra.mxu0 %vm119_vm11, %v3025_v23 }
 0x470   :  { %v2060_v50 = vpop.permute.xlu0 %2059  ;;  %v2056_v57 = vpop.permute.xlu1 %2055 }
 0x471   :  { %v2178_v51 = vpop.permute.xlu2 %2177  ;;  %v2062_v18 = vsel %vm388_vm14, %v2058_v48, %v2060_v50  ;;  %v2061_v36 = vsel %vm388_vm14, %v2056_v57, %v2058_v48 }
 0x478   :  { %v1946_v14 = vpop.permute.xlu0 %1945  ;;  %v1942_v35 = vpop.permute.xlu1 %1941 }
 0x479   :  { %v1948_v8 = vsel %vm255_vm13, %v1944_v54, %v1946_v14  ;;  %v2118_v2 = vpop.permute.xlu2 %2117  ;;  %v1947_v22 = vsel %vm255_vm13, %v1942_v35, %v1944_v54  ;;  %v3412_v54 = vld [vmem:[#allocation4_spill] sm:$0xff] }
 0x47a   :  { %2500 = vmatpush.msk.msra.mxu2 %vm123_vm5, %v1947_v22  ;;  %2502 = vmatpush.msk.msra.mxu3 %vm123_vm5, %v1948_v8 }
 0x47b   :  { %2503 = vmatmul.msk.f32.vlgmr.msra.gmra.mxu3 %vm119_vm11, %v3040_v56  ;;  %2501 = vmatmul.msk.f32.vlgmr.msra.gmra.mxu2 %vm119_vm11, %v3040_v56 }
 0x47c   :  { %2508 = vmatpush.msk.msrb.mxu2 %vm123_vm5, %v2061_v36  ;;  %2510 = vmatpush.msk.msrb.mxu3 %vm123_vm5, %v2062_v18  ;;  %v1874_v57 = vpop.f32.mrf.mxu3 }
 0x480   :  { %v2006_v23 = vpop.permute.xlu0 %2005  ;;  %v2002_v27 = vpop.permute.xlu1 %2001 }
 0x481   :  { %v2008_v62 = vsel %vm330_vm15, %v2004_v40, %v2006_v23  ;;  %v2292_v4 = vpop.permute.xlu2 %2291  ;;  %v2007_v42 = vsel %vm330_vm15, %v2002_v27, %v2004_v40 }
 0x482   :  { %2504 = vmatpush.msk.msrb.mxu0 %vm123_vm5, %v2007_v42  ;;  %2506 = vmatpush.msk.msrb.mxu1 %vm123_vm5, %v2008_v62 }
 0x483   :  { %2507 = vmatmul.msk.f32.vlgmr.msrb.gmra.mxu1 %vm119_vm11, %v3055_v7  ;;  %2505 = vmatmul.msk.f32.vlgmr.msrb.gmra.mxu0 %vm119_vm11, %v3055_v7 }
 0x484   :  { %2511 = vmatmul.msk.f32.vlgmr.msrb.gmra.mxu3 %vm119_vm11, %v3062_v15  ;;  %2509 = vmatmul.msk.f32.vlgmr.msrb.gmra.mxu2 %vm119_vm11, %v3062_v15 }
 0x488   :  { %v2180_v56 = vpop.permute.xlu0 %2179  ;;  %v2176_v49 = vpop.permute.xlu1 %2175 }
 0x489   :  { %v2182_v34 = vsel %vm534_vm2, %v2178_v51, %v2180_v56  ;;  %v2232_v16 = vpop.permute.xlu2 %2231  ;;  %v2181_v10 = vsel %vm534_vm2, %v2176_v49, %v2178_v51  ;;  %v1854_v51 = vpop.f32.mrf.mxu2 }
 0x48a   :  { %2516 = vmatpush.msk.msra.mxu2 %vm123_vm5, %v2181_v10  ;;  %2518 = vmatpush.msk.msra.mxu3 %vm123_vm5, %v2182_v34 }
 0x48c   :  { %2519 = vmatmul.msk.f32.vlgmr.msra.gmra.mxu3 %vm119_vm11, %v3100_v61  ;;  %2517 = vmatmul.msk.f32.vlgmr.msra.gmra.mxu2 %vm119_vm11, %v3100_v61 }
 0x490   :  { %v2120_v7 = vpop.permute.xlu0 %2119  ;;  %v2116_v17 = vpop.permute.xlu1 %2115 }
 0x491   :  { %v2122_v15 = vsel %vm461_vm0, %v2118_v2, %v2120_v7  ;;  %v99_v52 = vpop.permute.xlu2 %98  ;;  %v2121_v45 = vsel %vm461_vm0, %v2116_v17, %v2118_v2 }
 0x492   :  { %v782_v21 = vadd.f32 %v3208_v43, %v99_v52  ;;  %v783_v12 = vadd.f32 %v3210_v11, %v99_v52  ;;  %2512 = vmatpush.msk.msra.mxu0 %vm123_vm5, %v2121_v45  ;;  %2514 = vmatpush.msk.msra.mxu1 %vm123_vm5, %v2122_v15  ;;  %v1878_v22 = vadd.f32 %v1874_v57, %v99_v52 }
 0x493   :  { %2515 = vmatmul.msk.f32.vlgmr.msra.gmra.mxu1 %vm119_vm11, %v3077_v33  ;;  %2513 = vmatmul.msk.f32.vlgmr.msra.gmra.mxu0 %vm119_vm11, %v3077_v33  ;;  %v1877_v18 = vadd.f32 %v1854_v51, %v99_v52 }
 0x494   :  { %v841_v61 = vadd.f32 %v3204_v20, %v782_v21  ;;  %v842_v13 = vadd.f32 %v3206_v58, %v783_v12 }
 0x496   :  { %v904_v28 = vadd.f32 %v3216_v3, %v841_v61  ;;  %v905_v43 = vadd.f32 %v3218_v6, %v842_v13  ;;  %v3406_v3 = vld [vmem:[#allocation8_spill] sm:$0xff] }
 0x498   :  { %v967_v11 = vadd.f32 %v3212_v0, %v904_v28  ;;  %v968_v19 = vadd.f32 %v3214_v1, %v905_v43  ;;  %v2294_v31 = vpop.permute.xlu0 %2293  ;;  %v2290_v24 = vpop.permute.xlu1 %2289  ;;  %v3405_v0 = vld [vmem:[#allocation5_spill] sm:$0xff] }
 0x499   :  { %v2296_v26 = vsel %vm665_vm3, %v2292_v4, %v2294_v31  ;;  %v2295_v29 = vsel %vm665_vm3, %v2290_v24, %v2292_v4 }
 0x49a   :  { %v1024_v33 = vadd.f32 %v3224_v5, %v967_v11  ;;  %v1025_v20 = vadd.f32 %v3226_v46, %v968_v19  ;;  %2524 = vmatpush.msk.msrb.mxu2 %vm123_vm5, %v2295_v29  ;;  %2526 = vmatpush.msk.msrb.mxu3 %vm123_vm5, %v2296_v26  ;;  %v2345_v26 = vld.sshfl [vmem:[#allocation1 + $0x8] sm:$0xff pattern:$0x75316420] }
 0x49b   :  { %2525 = vmatmul.msk.f32.vlgmr.msrb.gmra.mxu2 %vm119_vm11, %v3130_v63  ;;  %2527 = vmatmul.msk.f32.vlgmr.msrb.gmra.mxu3 %vm119_vm11, %v3130_v63  ;;  %v3410_v63 = vld [vmem:[#allocation10_spill] sm:$0xff] }
 0x49c   :  { %v1087_v58 = vadd.f32 %v3220_v9, %v1024_v33  ;;  %v1088_v1 = vadd.f32 %v3405_v0, %v1025_v20  ;;  %v2344_v20 = vld.sshfl [vmem:[#allocation1] sm:$0xff pattern:$0x75316420] }
 0x49e   :  { %v1150_v6 = vadd.f32 %v3406_v3, %v1087_v58  ;;  %v1151_v5 = vadd.f32 %v3407_v32, %v1088_v1 }
 0x4a0   :  { %v1207_v46 = vadd.f32 %v3408_v30, %v1150_v6  ;;  %v1208_v39 = vadd.f32 %v3409_v37, %v1151_v5  ;;  %v2234_v47 = vpop.permute.xlu0 %2233  ;;  %v2230_v53 = vpop.permute.xlu1 %2229 }
 0x4a1   :  { %v2236_v55 = vsel %vm592_vm1, %v2232_v16, %v2234_v47  ;;  %v2235_v38 = vsel %vm592_vm1, %v2230_v53, %v2232_v16 }
 0x4a2   :  { %2520 = vmatpush.msk.msrb.mxu0 %vm123_vm5, %v2235_v38  ;;  %2522 = vmatpush.msk.msrb.mxu1 %vm123_vm5, %v2236_v55  ;;  %v1270_v9 = vadd.f32 %v3410_v63, %v1207_v46  ;;  %v1271_v48 = vadd.f32 %v3411_v44, %v1208_v39 }
 0x4a3   :  { %2521 = vmatmul.msk.f32.vlgmr.msrb.gmra.mxu0 %vm119_vm11, %v3412_v54  ;;  %2523 = vmatmul.msk.f32.vlgmr.msrb.gmra.mxu1 %vm119_vm11, %v3412_v54 }
 0x4a4   :  { %v1278_v60 = vadd.f32 %v3413_v59, %v1271_v48  ;;  %v1277_v40 = vadd.f32 %v3414_v25, %v1270_v9 }
 0x4a6   :  { %v1281_v41 = vrot.slane %v1278_v60, 4 }
 0x4a8   :  { %v1282_v50 = vsel %vm123_vm5, %v1277_v40, %v1281_v41 }
 0x4a9   :  { %1284 = vst [vmem:[%s3392_s3] sm:$0xff] %v1282_v50 }
 0x4e8   :  { %v1930_v8 = vpop.f32.mrf.mxu1  ;;  %v1910_v2 = vpop.f32.mrf.mxu0 }
 0x4e9   :  { %v1934_v36 = vadd.f32 %v1930_v8, %v1878_v22  ;;  %v1933_v23 = vadd.f32 %v1910_v2, %v1877_v18 }
 0x4fe   :  { %v1990_v14 = vpop.f32.mrf.mxu3  ;;  %v1970_v35 = vpop.f32.mrf.mxu2 }
 0x4ff   :  { %v1994_v56 = vadd.f32 %v1990_v14, %v1934_v36  ;;  %v1993_v49 = vadd.f32 %v1970_v35, %v1933_v23 }
 0x500   :  { %v2050_v4 = vpop.f32.mrf.mxu1  ;;  %v2030_v42 = vpop.f32.mrf.mxu0 }
 0x501   :  { %v2054_v34 = vadd.f32 %v2050_v4, %v1994_v56  ;;  %v2053_v16 = vadd.f32 %v2030_v42, %v1993_v49 }
 0x507   :  { %v2104_v27 = vpop.f32.mrf.mxu3  ;;  %v2084_v62 = vpop.f32.mrf.mxu2 }
 0x508   :  { %v2108_v45 = vadd.f32 %v2104_v27, %v2054_v34  ;;  %v2107_v21 = vadd.f32 %v2084_v62, %v2053_v16 }
 0x50f   :  { %v2224_v10 = vpop.f32.mrf.mxu3  ;;  %v2204_v7 = vpop.f32.mrf.mxu2 }
 0x510   :  { %v2164_v17 = vpop.f32.mrf.mxu1  ;;  %v2144_v15 = vpop.f32.mrf.mxu0 }
 0x511   :  { %v2168_v12 = vadd.f32 %v2164_v17, %v2108_v45  ;;  %v2167_v61 = vadd.f32 %v2144_v15, %v2107_v21 }
 0x513   :  { %v2228_v13 = vadd.f32 %v2224_v10, %v2168_v12  ;;  %v2227_v52 = vadd.f32 %v2204_v7, %v2167_v61 }
 0x51e   :  { %v2318_v28 = vpop.f32.mrf.mxu2  ;;  %v2338_v43 = vpop.f32.mrf.mxu3 }
 0x520   :  { %v2258_v11 = vpop.f32.mrf.mxu0  ;;  %v2278_v19 = vpop.f32.mrf.mxu1 }
 0x521   :  { %v2281_v31 = vadd.f32 %v2258_v11, %v2227_v52  ;;  %v2282_v24 = vadd.f32 %v2278_v19, %v2228_v13 }
 0x523   :  { %v2341_v29 = vadd.f32 %v2318_v28, %v2281_v31  ;;  %v2342_v33 = vadd.f32 %v2338_v43, %v2282_v24 }
 0x525   :  { %v2349_v58 = vadd.f32 %v2345_v26, %v2342_v33  ;;  %v2348_v0 = vadd.f32 %v2344_v20, %v2341_v29 }
 0x527   :  { %v2352_v1 = vrot.slane %v2349_v58, 4 }
 0x529   :  { %v2353_v3 = vsel %vm123_vm5, %v2348_v0, %v2352_v1 }
 0x52a   :  { %2528 = vst [vmem:[%s3392_s3 + $0x8] sm:$0xff] %v2353_v3 }

</bundles_post_ra>
